<compile_context>
chip_gen: v7x
topology: tpu7x:2x2x1
jax: 0.10.0
libtpu: 0.0.40
codegen_flags: <defaults>
</compile_context>

<pallas_src>
import math

import jax
import jax.numpy as jnp
import numpy as np
from jax.experimental import pallas as pl


def _gelu_tanh(x):
    # TODO(synk): PyTorch nn.GELU() default is the exact erf GELU; the tanh
    # approximation is used here (erf lowering on Mosaic is not guaranteed).
    c = math.sqrt(2.0 / math.pi)
    return 0.5 * x * (1.0 + jnp.tanh(c * (x + 0.044715 * x * x * x)))


def _layer_norm(x, gamma, beta, eps=1e-5):
    mu = jnp.mean(x, axis=-1, keepdims=True)
    xc = x - mu
    var = jnp.mean(xc * xc, axis=-1, keepdims=True)
    return xc * jax.lax.rsqrt(var + eps) * gamma + beta


def decoder_block_forward(x, enc_out, la_mask, pad_mask, params, num_heads):
    B, T, D = x.shape
    S = enc_out.shape[1]
    P = params["wq1"].shape[1]              # proj_size
    hidden = params["wm1"].shape[1]         # 4 * d_model
    H = num_heads
    Dh = P // H
    BT, BS = B * T, B * S
    scale = jnp.float32(1.0 / math.sqrt(Dh))
    f32 = jnp.float32

    # ----------------- XLA-side packing (free, outside the kernel) -----------------
    # 1) activations: decoder rows on top, encoder rows below -> one input DMA.
    xe = jnp.concatenate(
        [x.reshape(BT, D).astype(f32), enc_out.reshape(BS, D).astype(f32)], axis=0)

    # 2) block-diagonal additive masks: batch folded into the sequence axis;
    #    cross-batch attention gets -1e30 -> exactly 0 after the softmax.
    #    (Note: like the previous version, a fully-masked query row would give a
    #    uniform row instead of NaN; not exercised here.)
    def block_additive(mask, t, s):
        add = jnp.where(mask == 1.0, f32(-1e30), f32(0.0))                # (t, s)
        same = jnp.kron(jnp.eye(B, dtype=f32), jnp.ones((t, s), f32))     # (B*t, B*s)
        return jnp.where(same == 1.0, jnp.tile(add, (B, B)), f32(-1e30))

    masks = jnp.concatenate(
        [block_additive(la_mask, T, T), block_additive(pad_mask, T, S)], axis=1)

    # 3) softmax scale folded into the query projections.
    wq1s, bq1s = params["wq1"] * scale, params["bq1"] * scale
    wq2s, bq2s = params["wq2"] * scale, params["bq2"] * scale

    # 4) weight slabs.
    w_slab = jnp.concatenate(
        [wq1s, params["wk1"], params["wv1"],        # [0   : 3P)  self-attn q|k|v
         params["wk2"], params["wv2"],              # [3P  : 5P)  cross-attn k|v
         wq2s,                                      # [5P  : 6P)  cross-attn q
         params["wm1"]], axis=1).astype(f32)        # [6P  : 6P+hidden)  MLP up-proj
    wo_slab = jnp.concatenate([params["wo1"], params["wo2"]], axis=1).astype(f32)  # (P, 2D)
    wm2 = params["wm2"].astype(f32)                                                # (hidden, D)

    # 5) all biases / LayerNorm vectors in one (8, L) slab.
    raw_rows = [
        [bq1s, params["bk1"], params["bv1"]],            # row 0: b_qkv1     (3P)
        [params["bk2"], params["bv2"]],                  # row 1: b_kv2      (2P)
        [bq2s],                                          # row 2: bq2        (P)
        [params["bo1"], params["bo2"], params["bm2"]],   # row 3: bo1|bo2|bm2 (3D)
        [params["g1"], params["b1"]],                    # row 4: ln1        (2D)
        [params["g2"], params["b2"]],                    # row 5: ln2        (2D)
        [params["g3"], params["b3"]],                    # row 6: ln3        (2D)
        [params["bm1"]],                                 # row 7: bm1        (hidden)
    ]
    cat_rows = [jnp.concatenate([jnp.ravel(v).astype(f32) for v in r]) for r in raw_rows]
    L = max(int(r.shape[0]) for r in cat_rows)
    vec_slab = jnp.stack([jnp.pad(r, (0, L - r.shape[0])) for r in cat_rows])   # (8, L)

    # --------------------------------- kernel ---------------------------------
    def kernel(xe_ref, m_ref, w_ref, wo_ref, wm2_ref, vec_ref,
               out_ref, aw1_ref, aw2_ref):
        xe_v = xe_ref[...]                      # (BT+BS, D)
        xf = xe_v[0:BT, :]                      # decoder activations
        neg_la = m_ref[:, 0:BT]                 # (BT, BT) additive self-attn mask
        neg_pm = m_ref[:, BT:BT + BS]           # (BT, BS) additive cross-attn mask

        # Fused projections for everything available at kernel start:
        # self-attn Q/K/V (decoder rows) and cross-attn K/V (encoder rows).
        p0 = jnp.dot(xe_v, w_ref[:, 0:5 * P], preferred_element_type=jnp.float32)
        qkv1 = p0[0:BT, 0:3 * P] + vec_ref[0:1, 0:3 * P]            # (BT, 3P)
        kv2 = p0[BT:BT + BS, 3 * P:5 * P] + vec_ref[1:2, 0:2 * P]   # (BS, 2P)

        def heads(z, off):
            # (N, *) -> (H, N, Dh): H static lane slices + one stack.
            return jnp.stack(
                [z[:, off + h * Dh: off + (h + 1) * Dh] for h in range(H)], axis=0)

        def attention(qh, kh, vh, neg_mask, aw_ref):
            # ONE H-batched score matmul over the whole (batch-folded) sequence.
            att = jnp.einsum("hnd,hmd->hnm", qh, kh,
                             preferred_element_type=jnp.float32)
            att = att + neg_mask[None, :, :]
            mx = jnp.max(att, axis=-1, keepdims=True)
            e = jnp.exp(att - mx)
            denom = jnp.sum(e, axis=-1, keepdims=True)
            aw = e * pl.reciprocal(denom, approx=True)   # rows ~normalized (approx recip)
            aw_ref[...] = aw                             # one slab store per MHA
            y = jnp.einsum("hnm,hmd->hnd", aw, vh,
                           preferred_element_type=jnp.float32)
            # head-concat -> single (BT, P) operand for the output projection
            return jnp.concatenate([y[h] for h in range(H)], axis=1)

        # masked self-attention + residual + LN1 (dropout = identity)
        y1 = attention(heads(qkv1, 0), heads(qkv1, P), heads(qkv1, 2 * P),
                       neg_la, aw1_ref)
        a1 = jnp.dot(y1, wo_ref[:, 0:D],
                     preferred_element_type=jnp.float32) + vec_ref[3:4, 0:D]
        x1 = _layer_norm(xf + a1, vec_ref[4:5, 0:D], vec_ref[4:5, D:2 * D])

        # encoder-decoder cross attention + residual + LN2
        q2 = jnp.dot(x1, w_ref[:, 5 * P:6 * P],
                     preferred_element_type=jnp.float32) + vec_ref[2:3, 0:P]
        y2 = attention(heads(q2, 0), heads(kv2, 0), heads(kv2, P),
                       neg_pm, aw2_ref)
        a2 = jnp.dot(y2, wo_ref[:, D:2 * D],
                     preferred_element_type=jnp.float32) + vec_ref[3:4, D:2 * D]
        x2 = _layer_norm(x1 + a2, vec_ref[5:6, 0:D], vec_ref[5:6, D:2 * D])

        # MLP: Linear -> GELU -> Linear, then x2 + LN3(x2 + mlp(x2))
        h1 = _gelu_tanh(jnp.dot(x2, w_ref[:, 6 * P:6 * P + hidden],
                                preferred_element_type=jnp.float32)
                        + vec_ref[7:8, 0:hidden])
        mlp = jnp.dot(h1, wm2_ref[...],
                      preferred_element_type=jnp.float32) + vec_ref[3:4, 2 * D:3 * D]
        x3 = x2 + _layer_norm(x2 + mlp, vec_ref[6:7, 0:D], vec_ref[6:7, D:2 * D])

        out_ref[...] = x3.astype(out_ref.dtype)

    out2d, aw1f, aw2f = pl.pallas_call(
        kernel,
        out_shape=(jax.ShapeDtypeStruct((BT, D), f32),
                   jax.ShapeDtypeStruct((H, BT, BT), f32),
                   jax.ShapeDtypeStruct((H, BT, BS), f32)),
    )(xe, masks, w_slab, wo_slab, wm2, vec_slab)

    # XLA-side (free): pick the per-batch diagonal blocks -> (B, H, T, S).
    aw1 = jnp.stack([aw1f[:, b * T:(b + 1) * T, b * T:(b + 1) * T] for b in range(B)], axis=0)
    aw2 = jnp.stack([aw2f[:, b * T:(b + 1) * T, b * S:(b + 1) * S] for b in range(B)], axis=0)
    return out2d.reshape(B, T, D), aw1, aw2


# ----------------------- pure-JAX reference (for checking) ------------------
def decoder_block_ref(x, enc_out, la_mask, pad_mask, p, H):
    def linear(a, w, b):
        return a @ w + b

    def mha(xq, xkv, wq, bq, wk, bk, wv, bv, wo, bo, mask):
        B, T, _ = xq.shape
        S = xkv.shape[1]
        q = linear(xq, wq, bq)
        k = linear(xkv, wk, bk)
        v = linear(xkv, wv, bv)
        P = q.shape[-1]
        Dh = P // H
        q = q.reshape(B, T, H, Dh).transpose(0, 2, 1, 3)
        k = k.reshape(B, S, H, Dh).transpose(0, 2, 1, 3)
        v = v.reshape(B, S, H, Dh).transpose(0, 2, 1, 3)
        att = jnp.einsum("bhtd,bhsd->bhts", q, k) * (1.0 / math.sqrt(Dh))
        att = jnp.where(mask[None, None] == 1.0, -jnp.inf, att)
        aw = jax.nn.softmax(att, axis=-1)
        y = jnp.einsum("bhts,bhsd->bhtd", aw, v)
        y = y.transpose(0, 2, 1, 3).reshape(B, T, P)
        return linear(y, wo, bo), aw

    a1, aw1 = mha(x, x, p["wq1"], p["bq1"], p["wk1"], p["bk1"],
                  p["wv1"], p["bv1"], p["wo1"], p["bo1"], la_mask)
    x1 = _layer_norm(x + a1, p["g1"], p["b1"])
    a2, aw2 = mha(x1, enc_out, p["wq2"], p["bq2"], p["wk2"], p["bk2"],
                  p["wv2"], p["bv2"], p["wo2"], p["bo2"], pad_mask)
    x2 = _layer_norm(x1 + a2, p["g2"], p["b2"])
    mlp = linear(_gelu_tanh(linear(x2, p["wm1"], p["bm1"])), p["wm2"], p["bm2"])
    x3 = x2 + _layer_norm(x2 + mlp, p["g3"], p["b3"])
    return x3, aw1, aw2


if __name__ == "__main__":
    # config: n_embd=32, proj_size=32, num_heads=4, d_model=32 (mlp hidden 128)
    B, T, S = 2, 8, 8
    n_embd, proj_size, d_model, num_heads = 32, 32, 32, 4
    hidden = 4 * d_model

    key = jax.random.PRNGKey(0)
    keys = iter(jax.random.split(key, 32))

    def w(shape, scale=0.05):
        return (scale * jax.random.normal(next(keys), shape)).astype(jnp.float32)

    params = {
        # mha1
        "wq1": w((n_embd, proj_size)), "bq1": w((proj_size,)),
        "wk1": w((n_embd, proj_size)), "bk1": w((proj_size,)),
        "wv1": w((n_embd, proj_size)), "bv1": w((proj_size,)),
        "wo1": w((proj_size, n_embd)), "bo1": w((n_embd,)),
        # mha2
        "wq2": w((n_embd, proj_size)), "bq2": w((proj_size,)),
        "wk2": w((n_embd, proj_size)), "bk2": w((proj_size,)),
        "wv2": w((n_embd, proj_size)), "bv2": w((proj_size,)),
        "wo2": w((proj_size, n_embd)), "bo2": w((n_embd,)),
        # layer norms
        "g1": jnp.ones((n_embd,), jnp.float32), "b1": jnp.zeros((n_embd,), jnp.float32),
        "g2": jnp.ones((n_embd,), jnp.float32), "b2": jnp.zeros((n_embd,), jnp.float32),
        "g3": jnp.ones((n_embd,), jnp.float32), "b3": jnp.zeros((n_embd,), jnp.float32),
        # mlp
        "wm1": w((n_embd, hidden)), "bm1": w((hidden,)),
        "wm2": w((hidden, n_embd)), "bm2": w((n_embd,)),
    }

    x = jax.random.normal(next(keys), (B, T, n_embd), dtype=jnp.float32)
    enc_out = jax.random.normal(next(keys), (B, S, n_embd), dtype=jnp.float32)
    # causal look-ahead mask: 1.0 where future positions are masked
    la_mask = jnp.triu(jnp.ones((T, T), jnp.float32), k=1)
    # no padding in this synthetic example
    pad_mask = jnp.zeros((T, S), jnp.float32)

    out, aw1, aw2 = decoder_block_forward(x, enc_out, la_mask, pad_mask, params, num_heads)
    out = jax.block_until_ready(out)

    ref_out, ref_aw1, ref_aw2 = decoder_block_ref(x, enc_out, la_mask, pad_mask, params, num_heads)
    np.testing.assert_allclose(np.asarray(out), np.asarray(ref_out), rtol=1e-2, atol=1e-2)
    np.testing.assert_allclose(np.asarray(aw1), np.asarray(ref_aw1), rtol=1e-2, atol=1e-2)
    np.testing.assert_allclose(np.asarray(aw2), np.asarray(ref_aw2), rtol=1e-2, atol=1e-2)

    print("KERNEL_OK")
</pallas_src>

<mosaic_0001>
module attributes {stable_mosaic.version = 11 : i64} {
  func.func @kernel(%arg0: memref<32x32xf32, #tpu.memory_space<vmem>>, %arg1: memref<16x32xf32, #tpu.memory_space<vmem>>, %arg2: memref<32x320xf32, #tpu.memory_space<vmem>>, %arg3: memref<32x64xf32, #tpu.memory_space<vmem>>, %arg4: memref<128x32xf32, #tpu.memory_space<vmem>>, %arg5: memref<8x128xf32, #tpu.memory_space<vmem>>, %arg6: memref<16x32xf32, #tpu.memory_space<vmem>>, %arg7: memref<4x16x16xf32, #tpu.memory_space<vmem>>, %arg8: memref<4x16x16xf32, #tpu.memory_space<vmem>>) attributes {dimension_semantics = [], scalar_prefetch = 0 : i64, scratch_operands = 0 : i64, tpu.core_type = #tpu.core_type<tc>} {
    %c0 = arith.constant 0 : index
    %c0_0 = arith.constant 0 : index
    %0 = vector.load %arg0[%c0, %c0_0] : memref<32x32xf32, #tpu.memory_space<vmem>>, vector<32x32xf32>
    %1 = vector.extract_strided_slice %0 {offsets = [0, 0], sizes = [16, 32], strides = [1, 1]} : vector<32x32xf32> to vector<16x32xf32>
    %c0_1 = arith.constant 0 : index
    %c0_2 = arith.constant 0 : index
    %2 = vector.load %arg1[%c0_1, %c0_2] : memref<16x32xf32, #tpu.memory_space<vmem>>, vector<16x16xf32>
    %c0_3 = arith.constant 0 : index
    %c16 = arith.constant 16 : index
    %3 = vector.load %arg1[%c0_3, %c16] : memref<16x32xf32, #tpu.memory_space<vmem>>, vector<16x16xf32>
    %c0_4 = arith.constant 0 : index
    %c0_5 = arith.constant 0 : index
    %4 = vector.load %arg2[%c0_4, %c0_5] : memref<32x320xf32, #tpu.memory_space<vmem>>, vector<32x160xf32>
    %cst = arith.constant dense<0.000000e+00> : vector<32x160xf32>
    %5 = tpu.matmul %0, %4, %cst {dimension_numbers = #tpu.dot_dimension_numbers<[1], [0], [0], [1], [0, 0, 1, 1], [], []>} : vector<32x32xf32>, vector<32x160xf32>, vector<32x160xf32> -> vector<32x160xf32>
    %6 = vector.extract_strided_slice %5 {offsets = [0, 0], sizes = [16, 96], strides = [1, 1]} : vector<32x160xf32> to vector<16x96xf32>
    %c0_6 = arith.constant 0 : index
    %c0_7 = arith.constant 0 : index
    %7 = vector.load %arg5[%c0_6, %c0_7] : memref<8x128xf32, #tpu.memory_space<vmem>>, vector<1x96xf32>
    %8 = vector.broadcast %7 : vector<1x96xf32> to vector<16x96xf32>
    %9 = arith.addf %6, %8 : vector<16x96xf32>
    %10 = vector.extract_strided_slice %5 {offsets = [16, 96], sizes = [16, 64], strides = [1, 1]} : vector<32x160xf32> to vector<16x64xf32>
    %c1 = arith.constant 1 : index
    %c0_8 = arith.constant 0 : index
    %11 = vector.load %arg5[%c1, %c0_8] : memref<8x128xf32, #tpu.memory_space<vmem>>, vector<1x64xf32>
    %12 = vector.broadcast %11 : vector<1x64xf32> to vector<16x64xf32>
    %13 = arith.addf %10, %12 : vector<16x64xf32>
    %14 = vector.extract_strided_slice %9 {offsets = [0, 0], sizes = [16, 8], strides = [1, 1]} : vector<16x96xf32> to vector<16x8xf32>
    %15 = vector.extract_strided_slice %9 {offsets = [0, 8], sizes = [16, 8], strides = [1, 1]} : vector<16x96xf32> to vector<16x8xf32>
    %16 = vector.extract_strided_slice %9 {offsets = [0, 16], sizes = [16, 8], strides = [1, 1]} : vector<16x96xf32> to vector<16x8xf32>
    %17 = vector.extract_strided_slice %9 {offsets = [0, 24], sizes = [16, 8], strides = [1, 1]} : vector<16x96xf32> to vector<16x8xf32>
    %18 = vector.shape_cast %14 : vector<16x8xf32> to vector<1x16x8xf32>
    %19 = vector.shape_cast %15 : vector<16x8xf32> to vector<1x16x8xf32>
    %20 = vector.shape_cast %16 : vector<16x8xf32> to vector<1x16x8xf32>
    %21 = vector.shape_cast %17 : vector<16x8xf32> to vector<1x16x8xf32>
    %22 = tpu.concatenate %18, %19, %20, %21 in 0 : vector<1x16x8xf32>, vector<1x16x8xf32>, vector<1x16x8xf32>, vector<1x16x8xf32> -> vector<4x16x8xf32>
    %23 = vector.extract_strided_slice %9 {offsets = [0, 32], sizes = [16, 8], strides = [1, 1]} : vector<16x96xf32> to vector<16x8xf32>
    %24 = vector.extract_strided_slice %9 {offsets = [0, 40], sizes = [16, 8], strides = [1, 1]} : vector<16x96xf32> to vector<16x8xf32>
    %25 = vector.extract_strided_slice %9 {offsets = [0, 48], sizes = [16, 8], strides = [1, 1]} : vector<16x96xf32> to vector<16x8xf32>
    %26 = vector.extract_strided_slice %9 {offsets = [0, 56], sizes = [16, 8], strides = [1, 1]} : vector<16x96xf32> to vector<16x8xf32>
    %27 = vector.shape_cast %23 : vector<16x8xf32> to vector<1x16x8xf32>
    %28 = vector.shape_cast %24 : vector<16x8xf32> to vector<1x16x8xf32>
    %29 = vector.shape_cast %25 : vector<16x8xf32> to vector<1x16x8xf32>
    %30 = vector.shape_cast %26 : vector<16x8xf32> to vector<1x16x8xf32>
    %31 = tpu.concatenate %27, %28, %29, %30 in 0 : vector<1x16x8xf32>, vector<1x16x8xf32>, vector<1x16x8xf32>, vector<1x16x8xf32> -> vector<4x16x8xf32>
    %32 = vector.extract_strided_slice %9 {offsets = [0, 64], sizes = [16, 8], strides = [1, 1]} : vector<16x96xf32> to vector<16x8xf32>
    %33 = vector.extract_strided_slice %9 {offsets = [0, 72], sizes = [16, 8], strides = [1, 1]} : vector<16x96xf32> to vector<16x8xf32>
    %34 = vector.extract_strided_slice %9 {offsets = [0, 80], sizes = [16, 8], strides = [1, 1]} : vector<16x96xf32> to vector<16x8xf32>
    %35 = vector.extract_strided_slice %9 {offsets = [0, 88], sizes = [16, 8], strides = [1, 1]} : vector<16x96xf32> to vector<16x8xf32>
    %36 = vector.shape_cast %32 : vector<16x8xf32> to vector<1x16x8xf32>
    %37 = vector.shape_cast %33 : vector<16x8xf32> to vector<1x16x8xf32>
    %38 = vector.shape_cast %34 : vector<16x8xf32> to vector<1x16x8xf32>
    %39 = vector.shape_cast %35 : vector<16x8xf32> to vector<1x16x8xf32>
    %40 = tpu.concatenate %36, %37, %38, %39 in 0 : vector<1x16x8xf32>, vector<1x16x8xf32>, vector<1x16x8xf32>, vector<1x16x8xf32> -> vector<4x16x8xf32>
    "tpu.trace_start"() <{level = 10 : i32, message = "hnd,hmd->hnm"}> : () -> ()
    %cst_9 = arith.constant dense<0.000000e+00> : vector<4x16x16xf32>
    %41 = tpu.matmul %22, %31, %cst_9 {dimension_numbers = #tpu.dot_dimension_numbers<[2], [2], [1], [1], [0, 0, 0, 1, 1, 1], [0], [0]>} : vector<4x16x8xf32>, vector<4x16x8xf32>, vector<4x16x16xf32> -> vector<4x16x16xf32>
    "tpu.trace_stop"() : () -> ()
    %42 = vector.shape_cast %2 : vector<16x16xf32> to vector<1x16x16xf32>
    %43 = vector.broadcast %42 : vector<1x16x16xf32> to vector<4x16x16xf32>
    %44 = arith.addf %41, %43 : vector<4x16x16xf32>
    %cst_10 = arith.constant dense<0xFF800000> : vector<4x16xf32>
    %45 = vector.multi_reduction <maximumf>, %44, %cst_10 [2] : vector<4x16x16xf32> to vector<4x16xf32>
    %46 = vector.shape_cast %45 : vector<4x16xf32> to vector<4x16x1xf32>
    %47 = vector.broadcast %46 : vector<4x16x1xf32> to vector<4x16x16xf32>
    %48 = arith.subf %44, %47 : vector<4x16x16xf32>
    %49 = math.exp %48 : vector<4x16x16xf32>
    %cst_11 = arith.constant dense<0.000000e+00> : vector<4x16xf32>
    %50 = vector.multi_reduction <add>, %49, %cst_11 [2] : vector<4x16x16xf32> to vector<4x16xf32>
    %51 = vector.shape_cast %50 : vector<4x16xf32> to vector<4x16x1xf32>
    %52 = tpu.reciprocal %51 {approx = true} : vector<4x16x1xf32> -> vector<4x16x1xf32>
    %53 = vector.broadcast %52 : vector<4x16x1xf32> to vector<4x16x16xf32>
    %54 = arith.mulf %49, %53 : vector<4x16x16xf32>
    %c0_12 = arith.constant 0 : index
    %c0_13 = arith.constant 0 : index
    %c0_14 = arith.constant 0 : index
    %55 = vector.load %arg7[%c0_12, %c0_13, %c0_14] : memref<4x16x16xf32, #tpu.memory_space<vmem>>, vector<4x16x16xf32>
    tpu.vector_store %arg7[%c0_12, %c0_13, %c0_14], %54 {strides = array<i32>} : memref<4x16x16xf32, #tpu.memory_space<vmem>>, vector<4x16x16xf32>,
    "tpu.trace_start"() <{level = 10 : i32, message = "hnm,hmd->hnd"}> : () -> ()
    %cst_15 = arith.constant dense<0.000000e+00> : vector<4x16x8xf32>
    %56 = tpu.matmul %54, %40, %cst_15 {dimension_numbers = #tpu.dot_dimension_numbers<[2], [1], [1], [2], [0, 0, 0, 1, 1, 2], [0], [0]>} : vector<4x16x16xf32>, vector<4x16x8xf32>, vector<4x16x8xf32> -> vector<4x16x8xf32>
    "tpu.trace_stop"() : () -> ()
    %57 = vector.extract_strided_slice %56 {offsets = [0, 0, 0], sizes = [1, 16, 8], strides = [1, 1, 1]} : vector<4x16x8xf32> to vector<1x16x8xf32>
    %58 = vector.shape_cast %57 : vector<1x16x8xf32> to vector<16x8xf32>
    %59 = vector.extract_strided_slice %56 {offsets = [1, 0, 0], sizes = [1, 16, 8], strides = [1, 1, 1]} : vector<4x16x8xf32> to vector<1x16x8xf32>
    %60 = vector.shape_cast %59 : vector<1x16x8xf32> to vector<16x8xf32>
    %61 = vector.extract_strided_slice %56 {offsets = [2, 0, 0], sizes = [1, 16, 8], strides = [1, 1, 1]} : vector<4x16x8xf32> to vector<1x16x8xf32>
    %62 = vector.shape_cast %61 : vector<1x16x8xf32> to vector<16x8xf32>
    %63 = vector.extract_strided_slice %56 {offsets = [3, 0, 0], sizes = [1, 16, 8], strides = [1, 1, 1]} : vector<4x16x8xf32> to vector<1x16x8xf32>
    %64 = vector.shape_cast %63 : vector<1x16x8xf32> to vector<16x8xf32>
    %65 = tpu.concatenate %58, %60, %62, %64 in 1 : vector<16x8xf32>, vector<16x8xf32>, vector<16x8xf32>, vector<16x8xf32> -> vector<16x32xf32>
    %c0_16 = arith.constant 0 : index
    %c0_17 = arith.constant 0 : index
    %66 = vector.load %arg3[%c0_16, %c0_17] : memref<32x64xf32, #tpu.memory_space<vmem>>, vector<32x32xf32>
    %cst_18 = arith.constant dense<0.000000e+00> : vector<16x32xf32>
    %67 = tpu.matmul %65, %66, %cst_18 {dimension_numbers = #tpu.dot_dimension_numbers<[1], [0], [0], [1], [0, 0, 1, 1], [], []>} : vector<16x32xf32>, vector<32x32xf32>, vector<16x32xf32> -> vector<16x32xf32>
    %c3 = arith.constant 3 : index
    %c0_19 = arith.constant 0 : index
    %68 = vector.load %arg5[%c3, %c0_19] : memref<8x128xf32, #tpu.memory_space<vmem>>, vector<1x32xf32>
    %69 = vector.broadcast %68 : vector<1x32xf32> to vector<16x32xf32>
    %70 = arith.addf %67, %69 : vector<16x32xf32>
    %71 = arith.addf %1, %70 : vector<16x32xf32>
    %c4 = arith.constant 4 : index
    %c0_20 = arith.constant 0 : index
    %72 = vector.load %arg5[%c4, %c0_20] : memref<8x128xf32, #tpu.memory_space<vmem>>, vector<1x32xf32>
    %c4_21 = arith.constant 4 : index
    %c32 = arith.constant 32 : index
    %73 = vector.load %arg5[%c4_21, %c32] : memref<8x128xf32, #tpu.memory_space<vmem>>, vector<1x32xf32>
    %cst_22 = arith.constant dense<0.000000e+00> : vector<16xf32>
    %74 = vector.multi_reduction <add>, %71, %cst_22 [1] : vector<16x32xf32> to vector<16xf32>
    %75 = vector.shape_cast %74 : vector<16xf32> to vector<16x1xf32>
    %cst_23 = arith.constant 3.200000e+01 : f32
    %76 = vector.broadcast %cst_23 : f32 to vector<16x1xf32>
    %77 = arith.divf %75, %76 : vector<16x1xf32>
    %78 = vector.broadcast %77 : vector<16x1xf32> to vector<16x32xf32>
    %79 = arith.subf %71, %78 : vector<16x32xf32>
    %80 = arith.mulf %79, %79 : vector<16x32xf32>
    %cst_24 = arith.constant dense<0.000000e+00> : vector<16xf32>
    %81 = vector.multi_reduction <add>, %80, %cst_24 [1] : vector<16x32xf32> to vector<16xf32>
    %82 = vector.shape_cast %81 : vector<16xf32> to vector<16x1xf32>
    %cst_25 = arith.constant 3.200000e+01 : f32
    %83 = vector.broadcast %cst_25 : f32 to vector<16x1xf32>
    %84 = arith.divf %82, %83 : vector<16x1xf32>
    %cst_26 = arith.constant 9.99999974E-6 : f32
    %85 = vector.broadcast %cst_26 : f32 to vector<16x1xf32>
    %86 = arith.addf %84, %85 : vector<16x1xf32>
    %87 = math.rsqrt %86 : vector<16x1xf32>
    %88 = vector.broadcast %87 : vector<16x1xf32> to vector<16x32xf32>
    %89 = arith.mulf %79, %88 : vector<16x32xf32>
    %90 = vector.broadcast %72 : vector<1x32xf32> to vector<16x32xf32>
    %91 = arith.mulf %89, %90 : vector<16x32xf32>
    %92 = vector.broadcast %73 : vector<1x32xf32> to vector<16x32xf32>
    %93 = arith.addf %91, %92 : vector<16x32xf32>
    %c0_27 = arith.constant 0 : index
    %c160 = arith.constant 160 : index
    %94 = vector.load %arg2[%c0_27, %c160] : memref<32x320xf32, #tpu.memory_space<vmem>>, vector<32x32xf32>
    %cst_28 = arith.constant dense<0.000000e+00> : vector<16x32xf32>
    %95 = tpu.matmul %93, %94, %cst_28 {dimension_numbers = #tpu.dot_dimension_numbers<[1], [0], [0], [1], [0, 0, 1, 1], [], []>} : vector<16x32xf32>, vector<32x32xf32>, vector<16x32xf32> -> vector<16x32xf32>
    %c2 = arith.constant 2 : index
    %c0_29 = arith.constant 0 : index
    %96 = vector.load %arg5[%c2, %c0_29] : memref<8x128xf32, #tpu.memory_space<vmem>>, vector<1x32xf32>
    %97 = vector.broadcast %96 : vector<1x32xf32> to vector<16x32xf32>
    %98 = arith.addf %95, %97 : vector<16x32xf32>
    %99 = vector.extract_strided_slice %98 {offsets = [0, 0], sizes = [16, 8], strides = [1, 1]} : vector<16x32xf32> to vector<16x8xf32>
    %100 = vector.extract_strided_slice %98 {offsets = [0, 8], sizes = [16, 8], strides = [1, 1]} : vector<16x32xf32> to vector<16x8xf32>
    %101 = vector.extract_strided_slice %98 {offsets = [0, 16], sizes = [16, 8], strides = [1, 1]} : vector<16x32xf32> to vector<16x8xf32>
    %102 = vector.extract_strided_slice %98 {offsets = [0, 24], sizes = [16, 8], strides = [1, 1]} : vector<16x32xf32> to vector<16x8xf32>
    %103 = vector.shape_cast %99 : vector<16x8xf32> to vector<1x16x8xf32>
    %104 = vector.shape_cast %100 : vector<16x8xf32> to vector<1x16x8xf32>
    %105 = vector.shape_cast %101 : vector<16x8xf32> to vector<1x16x8xf32>
    %106 = vector.shape_cast %102 : vector<16x8xf32> to vector<1x16x8xf32>
    %107 = tpu.concatenate %103, %104, %105, %106 in 0 : vector<1x16x8xf32>, vector<1x16x8xf32>, vector<1x16x8xf32>, vector<1x16x8xf32> -> vector<4x16x8xf32>
    %108 = vector.extract_strided_slice %13 {offsets = [0, 0], sizes = [16, 8], strides = [1, 1]} : vector<16x64xf32> to vector<16x8xf32>
    %109 = vector.extract_strided_slice %13 {offsets = [0, 8], sizes = [16, 8], strides = [1, 1]} : vector<16x64xf32> to vector<16x8xf32>
    %110 = vector.extract_strided_slice %13 {offsets = [0, 16], sizes = [16, 8], strides = [1, 1]} : vector<16x64xf32> to vector<16x8xf32>
    %111 = vector.extract_strided_slice %13 {offsets = [0, 24], sizes = [16, 8], strides = [1, 1]} : vector<16x64xf32> to vector<16x8xf32>
    %112 = vector.shape_cast %108 : vector<16x8xf32> to vector<1x16x8xf32>
    %113 = vector.shape_cast %109 : vector<16x8xf32> to vector<1x16x8xf32>
    %114 = vector.shape_cast %110 : vector<16x8xf32> to vector<1x16x8xf32>
    %115 = vector.shape_cast %111 : vector<16x8xf32> to vector<1x16x8xf32>
    %116 = tpu.concatenate %112, %113, %114, %115 in 0 : vector<1x16x8xf32>, vector<1x16x8xf32>, vector<1x16x8xf32>, vector<1x16x8xf32> -> vector<4x16x8xf32>
    %117 = vector.extract_strided_slice %13 {offsets = [0, 32], sizes = [16, 8], strides = [1, 1]} : vector<16x64xf32> to vector<16x8xf32>
    %118 = vector.extract_strided_slice %13 {offsets = [0, 40], sizes = [16, 8], strides = [1, 1]} : vector<16x64xf32> to vector<16x8xf32>
    %119 = vector.extract_strided_slice %13 {offsets = [0, 48], sizes = [16, 8], strides = [1, 1]} : vector<16x64xf32> to vector<16x8xf32>
    %120 = vector.extract_strided_slice %13 {offsets = [0, 56], sizes = [16, 8], strides = [1, 1]} : vector<16x64xf32> to vector<16x8xf32>
    %121 = vector.shape_cast %117 : vector<16x8xf32> to vector<1x16x8xf32>
    %122 = vector.shape_cast %118 : vector<16x8xf32> to vector<1x16x8xf32>
    %123 = vector.shape_cast %119 : vector<16x8xf32> to vector<1x16x8xf32>
    %124 = vector.shape_cast %120 : vector<16x8xf32> to vector<1x16x8xf32>
    %125 = tpu.concatenate %121, %122, %123, %124 in 0 : vector<1x16x8xf32>, vector<1x16x8xf32>, vector<1x16x8xf32>, vector<1x16x8xf32> -> vector<4x16x8xf32>
    "tpu.trace_start"() <{level = 10 : i32, message = "hnd,hmd->hnm"}> : () -> ()
    %cst_30 = arith.constant dense<0.000000e+00> : vector<4x16x16xf32>
    %126 = tpu.matmul %107, %116, %cst_30 {dimension_numbers = #tpu.dot_dimension_numbers<[2], [2], [1], [1], [0, 0, 0, 1, 1, 1], [0], [0]>} : vector<4x16x8xf32>, vector<4x16x8xf32>, vector<4x16x16xf32> -> vector<4x16x16xf32>
    "tpu.trace_stop"() : () -> ()
    %127 = vector.shape_cast %3 : vector<16x16xf32> to vector<1x16x16xf32>
    %128 = vector.broadcast %127 : vector<1x16x16xf32> to vector<4x16x16xf32>
    %129 = arith.addf %126, %128 : vector<4x16x16xf32>
    %cst_31 = arith.constant dense<0xFF800000> : vector<4x16xf32>
    %130 = vector.multi_reduction <maximumf>, %129, %cst_31 [2] : vector<4x16x16xf32> to vector<4x16xf32>
    %131 = vector.shape_cast %130 : vector<4x16xf32> to vector<4x16x1xf32>
    %132 = vector.broadcast %131 : vector<4x16x1xf32> to vector<4x16x16xf32>
    %133 = arith.subf %129, %132 : vector<4x16x16xf32>
    %134 = math.exp %133 : vector<4x16x16xf32>
    %cst_32 = arith.constant dense<0.000000e+00> : vector<4x16xf32>
    %135 = vector.multi_reduction <add>, %134, %cst_32 [2] : vector<4x16x16xf32> to vector<4x16xf32>
    %136 = vector.shape_cast %135 : vector<4x16xf32> to vector<4x16x1xf32>
    %137 = tpu.reciprocal %136 {approx = true} : vector<4x16x1xf32> -> vector<4x16x1xf32>
    %138 = vector.broadcast %137 : vector<4x16x1xf32> to vector<4x16x16xf32>
    %139 = arith.mulf %134, %138 : vector<4x16x16xf32>
    %c0_33 = arith.constant 0 : index
    %c0_34 = arith.constant 0 : index
    %c0_35 = arith.constant 0 : index
    %140 = vector.load %arg8[%c0_33, %c0_34, %c0_35] : memref<4x16x16xf32, #tpu.memory_space<vmem>>, vector<4x16x16xf32>
    tpu.vector_store %arg8[%c0_33, %c0_34, %c0_35], %139 {strides = array<i32>} : memref<4x16x16xf32, #tpu.memory_space<vmem>>, vector<4x16x16xf32>,
    "tpu.trace_start"() <{level = 10 : i32, message = "hnm,hmd->hnd"}> : () -> ()
    %cst_36 = arith.constant dense<0.000000e+00> : vector<4x16x8xf32>
    %141 = tpu.matmul %139, %125, %cst_36 {dimension_numbers = #tpu.dot_dimension_numbers<[2], [1], [1], [2], [0, 0, 0, 1, 1, 2], [0], [0]>} : vector<4x16x16xf32>, vector<4x16x8xf32>, vector<4x16x8xf32> -> vector<4x16x8xf32>
    "tpu.trace_stop"() : () -> ()
    %142 = vector.extract_strided_slice %141 {offsets = [0, 0, 0], sizes = [1, 16, 8], strides = [1, 1, 1]} : vector<4x16x8xf32> to vector<1x16x8xf32>
    %143 = vector.shape_cast %142 : vector<1x16x8xf32> to vector<16x8xf32>
    %144 = vector.extract_strided_slice %141 {offsets = [1, 0, 0], sizes = [1, 16, 8], strides = [1, 1, 1]} : vector<4x16x8xf32> to vector<1x16x8xf32>
    %145 = vector.shape_cast %144 : vector<1x16x8xf32> to vector<16x8xf32>
    %146 = vector.extract_strided_slice %141 {offsets = [2, 0, 0], sizes = [1, 16, 8], strides = [1, 1, 1]} : vector<4x16x8xf32> to vector<1x16x8xf32>
    %147 = vector.shape_cast %146 : vector<1x16x8xf32> to vector<16x8xf32>
    %148 = vector.extract_strided_slice %141 {offsets = [3, 0, 0], sizes = [1, 16, 8], strides = [1, 1, 1]} : vector<4x16x8xf32> to vector<1x16x8xf32>
    %149 = vector.shape_cast %148 : vector<1x16x8xf32> to vector<16x8xf32>
    %150 = tpu.concatenate %143, %145, %147, %149 in 1 : vector<16x8xf32>, vector<16x8xf32>, vector<16x8xf32>, vector<16x8xf32> -> vector<16x32xf32>
    %c0_37 = arith.constant 0 : index
    %c32_38 = arith.constant 32 : index
    %151 = vector.load %arg3[%c0_37, %c32_38] : memref<32x64xf32, #tpu.memory_space<vmem>>, vector<32x32xf32>
    %cst_39 = arith.constant dense<0.000000e+00> : vector<16x32xf32>
    %152 = tpu.matmul %150, %151, %cst_39 {dimension_numbers = #tpu.dot_dimension_numbers<[1], [0], [0], [1], [0, 0, 1, 1], [], []>} : vector<16x32xf32>, vector<32x32xf32>, vector<16x32xf32> -> vector<16x32xf32>
    %c3_40 = arith.constant 3 : index
    %c32_41 = arith.constant 32 : index
    %153 = vector.load %arg5[%c3_40, %c32_41] : memref<8x128xf32, #tpu.memory_space<vmem>>, vector<1x32xf32>
    %154 = vector.broadcast %153 : vector<1x32xf32> to vector<16x32xf32>
    %155 = arith.addf %152, %154 : vector<16x32xf32>
    %156 = arith.addf %93, %155 : vector<16x32xf32>
    %c5 = arith.constant 5 : index
    %c0_42 = arith.constant 0 : index
    %157 = vector.load %arg5[%c5, %c0_42] : memref<8x128xf32, #tpu.memory_space<vmem>>, vector<1x32xf32>
    %c5_43 = arith.constant 5 : index
    %c32_44 = arith.constant 32 : index
    %158 = vector.load %arg5[%c5_43, %c32_44] : memref<8x128xf32, #tpu.memory_space<vmem>>, vector<1x32xf32>
    %cst_45 = arith.constant dense<0.000000e+00> : vector<16xf32>
    %159 = vector.multi_reduction <add>, %156, %cst_45 [1] : vector<16x32xf32> to vector<16xf32>
    %160 = vector.shape_cast %159 : vector<16xf32> to vector<16x1xf32>
    %cst_46 = arith.constant 3.200000e+01 : f32
    %161 = vector.broadcast %cst_46 : f32 to vector<16x1xf32>
    %162 = arith.divf %160, %161 : vector<16x1xf32>
    %163 = vector.broadcast %162 : vector<16x1xf32> to vector<16x32xf32>
    %164 = arith.subf %156, %163 : vector<16x32xf32>
    %165 = arith.mulf %164, %164 : vector<16x32xf32>
    %cst_47 = arith.constant dense<0.000000e+00> : vector<16xf32>
    %166 = vector.multi_reduction <add>, %165, %cst_47 [1] : vector<16x32xf32> to vector<16xf32>
    %167 = vector.shape_cast %166 : vector<16xf32> to vector<16x1xf32>
    %cst_48 = arith.constant 3.200000e+01 : f32
    %168 = vector.broadcast %cst_48 : f32 to vector<16x1xf32>
    %169 = arith.divf %167, %168 : vector<16x1xf32>
    %cst_49 = arith.constant 9.99999974E-6 : f32
    %170 = vector.broadcast %cst_49 : f32 to vector<16x1xf32>
    %171 = arith.addf %169, %170 : vector<16x1xf32>
    %172 = math.rsqrt %171 : vector<16x1xf32>
    %173 = vector.broadcast %172 : vector<16x1xf32> to vector<16x32xf32>
    %174 = arith.mulf %164, %173 : vector<16x32xf32>
    %175 = vector.broadcast %157 : vector<1x32xf32> to vector<16x32xf32>
    %176 = arith.mulf %174, %175 : vector<16x32xf32>
    %177 = vector.broadcast %158 : vector<1x32xf32> to vector<16x32xf32>
    %178 = arith.addf %176, %177 : vector<16x32xf32>
    %c0_50 = arith.constant 0 : index
    %c192 = arith.constant 192 : index
    %179 = vector.load %arg2[%c0_50, %c192] : memref<32x320xf32, #tpu.memory_space<vmem>>, vector<32x128xf32>
    %cst_51 = arith.constant dense<0.000000e+00> : vector<16x128xf32>
    %180 = tpu.matmul %178, %179, %cst_51 {dimension_numbers = #tpu.dot_dimension_numbers<[1], [0], [0], [1], [0, 0, 1, 1], [], []>} : vector<16x32xf32>, vector<32x128xf32>, vector<16x128xf32> -> vector<16x128xf32>
    %c7 = arith.constant 7 : index
    %c0_52 = arith.constant 0 : index
    %181 = vector.load %arg5[%c7, %c0_52] : memref<8x128xf32, #tpu.memory_space<vmem>>, vector<1x128xf32>
    %182 = vector.broadcast %181 : vector<1x128xf32> to vector<16x128xf32>
    %183 = arith.addf %180, %182 : vector<16x128xf32>
    %cst_53 = arith.constant 5.000000e-01 : f32
    %184 = vector.broadcast %cst_53 : f32 to vector<16x128xf32>
    %185 = arith.mulf %184, %183 : vector<16x128xf32>
    %cst_54 = arith.constant 4.471500e-02 : f32
    %186 = vector.broadcast %cst_54 : f32 to vector<16x128xf32>
    %187 = arith.mulf %186, %183 : vector<16x128xf32>
    %188 = arith.mulf %187, %183 : vector<16x128xf32>
    %189 = arith.mulf %188, %183 : vector<16x128xf32>
    %190 = arith.addf %183, %189 : vector<16x128xf32>
    %cst_55 = arith.constant 0.797884583 : f32
    %191 = vector.broadcast %cst_55 : f32 to vector<16x128xf32>
    %192 = arith.mulf %191, %190 : vector<16x128xf32>
    %193 = math.tanh %192 : vector<16x128xf32>
    %cst_56 = arith.constant 1.000000e+00 : f32
    %194 = vector.broadcast %cst_56 : f32 to vector<16x128xf32>
    %195 = arith.addf %194, %193 : vector<16x128xf32>
    %196 = arith.mulf %185, %195 : vector<16x128xf32>
    %c0_57 = arith.constant 0 : index
    %c0_58 = arith.constant 0 : index
    %197 = vector.load %arg4[%c0_57, %c0_58] : memref<128x32xf32, #tpu.memory_space<vmem>>, vector<128x32xf32>
    %cst_59 = arith.constant dense<0.000000e+00> : vector<16x32xf32>
    %198 = tpu.matmul %196, %197, %cst_59 {dimension_numbers = #tpu.dot_dimension_numbers<[1], [0], [0], [1], [0, 0, 1, 1], [], []>} : vector<16x128xf32>, vector<128x32xf32>, vector<16x32xf32> -> vector<16x32xf32>
    %c3_60 = arith.constant 3 : index
    %c64 = arith.constant 64 : index
    %199 = vector.load %arg5[%c3_60, %c64] : memref<8x128xf32, #tpu.memory_space<vmem>>, vector<1x32xf32>
    %200 = vector.broadcast %199 : vector<1x32xf32> to vector<16x32xf32>
    %201 = arith.addf %198, %200 : vector<16x32xf32>
    %202 = arith.addf %178, %201 : vector<16x32xf32>
    %c6 = arith.constant 6 : index
    %c0_61 = arith.constant 0 : index
    %203 = vector.load %arg5[%c6, %c0_61] : memref<8x128xf32, #tpu.memory_space<vmem>>, vector<1x32xf32>
    %c6_62 = arith.constant 6 : index
    %c32_63 = arith.constant 32 : index
    %204 = vector.load %arg5[%c6_62, %c32_63] : memref<8x128xf32, #tpu.memory_space<vmem>>, vector<1x32xf32>
    %cst_64 = arith.constant dense<0.000000e+00> : vector<16xf32>
    %205 = vector.multi_reduction <add>, %202, %cst_64 [1] : vector<16x32xf32> to vector<16xf32>
    %206 = vector.shape_cast %205 : vector<16xf32> to vector<16x1xf32>
    %cst_65 = arith.constant 3.200000e+01 : f32
    %207 = vector.broadcast %cst_65 : f32 to vector<16x1xf32>
    %208 = arith.divf %206, %207 : vector<16x1xf32>
    %209 = vector.broadcast %208 : vector<16x1xf32> to vector<16x32xf32>
    %210 = arith.subf %202, %209 : vector<16x32xf32>
    %211 = arith.mulf %210, %210 : vector<16x32xf32>
    %cst_66 = arith.constant dense<0.000000e+00> : vector<16xf32>
    %212 = vector.multi_reduction <add>, %211, %cst_66 [1] : vector<16x32xf32> to vector<16xf32>
    %213 = vector.shape_cast %212 : vector<16xf32> to vector<16x1xf32>
    %cst_67 = arith.constant 3.200000e+01 : f32
    %214 = vector.broadcast %cst_67 : f32 to vector<16x1xf32>
    %215 = arith.divf %213, %214 : vector<16x1xf32>
    %cst_68 = arith.constant 9.99999974E-6 : f32
    %216 = vector.broadcast %cst_68 : f32 to vector<16x1xf32>
    %217 = arith.addf %215, %216 : vector<16x1xf32>
    %218 = math.rsqrt %217 : vector<16x1xf32>
    %219 = vector.broadcast %218 : vector<16x1xf32> to vector<16x32xf32>
    %220 = arith.mulf %210, %219 : vector<16x32xf32>
    %221 = vector.broadcast %203 : vector<1x32xf32> to vector<16x32xf32>
    %222 = arith.mulf %220, %221 : vector<16x32xf32>
    %223 = vector.broadcast %204 : vector<1x32xf32> to vector<16x32xf32>
    %224 = arith.addf %222, %223 : vector<16x32xf32>
    %225 = arith.addf %178, %224 : vector<16x32xf32>
    %c0_69 = arith.constant 0 : index
    %c0_70 = arith.constant 0 : index
    %226 = vector.load %arg6[%c0_69, %c0_70] : memref<16x32xf32, #tpu.memory_space<vmem>>, vector<16x32xf32>
    tpu.vector_store %arg6[%c0_69, %c0_70], %225 {strides = array<i32>} : memref<16x32xf32, #tpu.memory_space<vmem>>, vector<16x32xf32>,
    return
  }
}

</mosaic_0001>

<bundles_post_ra>
// kernel: tpu_custom_call.1
= control target key start
LH: loop header
LB: loop body
LE: loop exit
PB: predicated region body
PF: predicated region fallthrough
CT: control target
= control target key end

     0   :  { %14 = vsyncpa [#allocation3], 0  ;;  %s4045_s0 = inlined_call_operand.vmem [shape: f32[32,32], index: 0, kind: input, shape index: {}]   ;;  %s4046_s1 = inlined_call_operand.hbm [shape: f32[16,32], index: 1, kind: input, shape index: {}]   ;;  %s4047_s2 = inlined_call_operand.vmem [shape: f32[32,320], index: 2, kind: input, shape index: {}]   ;;  %s4048_s3 = inlined_call_operand.vmem [shape: f32[32,64], index: 3, kind: input, shape index: {}]   ;;  %s4049_s4 = inlined_call_operand.vmem [shape: f32[128,32], index: 4, kind: input, shape index: {}]   ;;  %s4050_s5 = inlined_call_operand.vmem [shape: f32[8,128], index: 5, kind: input, shape index: {}]   ;;  %s4051_s6 = inlined_call_operand.hbm [shape: f32[16,32], index: 6, kind: output, shape index: {0}]   ;;  %s4052_s7 = inlined_call_operand.hbm [shape: f32[4,16,16], index: 7, kind: output, shape index: {1}]   ;;  %s4053_s8 = inlined_call_operand.hbm [shape: f32[4,16,16], index: 8, kind: output, shape index: {2}]  }
   0x1   :  { %15 = vsyncpa [#allocation4], 0 }
   0x2   :  { %16 = vsyncpa [#allocation7], 0  ;;  %s3427_s27 = smov [#allocation2]   ;;  %s3333_s9 = scalar_lea.hbm %s4046_s1, 256 }
   0x3   :  { %s24_s28 = sshll.u32 %s3427_s27, 4  ;;  %p3334_p0 = scmp.ne.s32.totalorder %s4046_s1, %s3333_s9  ;;  %s25_s28 = int_to_ptr.vmem [resolvable:$true] %s24_s28 }
   0x4   :  { %p3337_p1 = scmp.lt.u32.totalorder %s3333_s9, %s4046_s1 }
   0x6   :  { %p3339_p2 = pnand %p3337_p1, %p3334_p0 }
   0x8   :  { %3342 = shalt.err (!%p3339_p2)
}
   0x9   :  { %s3343_s14 = scalar_lea.vmem %s25_s28, 256  ;;  %p3348_p4 = scmp.lt.s32.totalorder %s25_s28, %s25_s28 }
   0xa   :  { %p3344_p3 = scmp.ne.s32.totalorder %s25_s28, %s3343_s14  ;;  %p3349_p5 = scmp.lt.s32.totalorder %s3343_s14, %s3343_s14 }
   0xc   :  { %p3350_p6 = por %p3349_p5, %p3348_p4 }
   0xe   :  { %p3351_p7 = pnand %p3350_p6, %p3344_p3 }
  0x10   :  { %3354 = shalt.err (!%p3351_p7)
}
  0x11   :  { %s3428_s15 = smov 128   ;;  %s3429_s16 = smov 8  }
  0x12   :  { %30 = dma.hbm_to_vmem [thread:$0]  %s4046_s1, 256, %s25_s28, [#allocation3], %s3428_s15, %s3428_s15, %s3429_s16  }
  0x13   :  { %3421 = dma.done.wait [#allocation3], 256  }
  0x14   :  { %3422 = vsyncadd [#allocation3], 4294967040  ;;  %v3430_v0 = vmov 0.0   ;;  %v3505_v1 = vld [vmem:[%s4047_s2 + $0x8] sm:$0xff]  ;;  %v3510_v2 = vld [vmem:[%s4047_s2 + $0x20] sm:$0xff]  ;;  %vm56_vm0 = vcmask 261120  }
  0x15   :  { %133 = vmatprep.mubr.f32.mxu1 %v3430_v0  ;;  %v48_v3 = vld [vmem:[%s4047_s2] sm:$0xff]  ;;  %v2956_v4 = vpack.c.bf16 %v3510_v2, %v3505_v1  ;;  %v50_v5 = vld [vmem:[%s4047_s2 + $0x18] sm:$0xff]  ;;  %v3528_v7 = vld [vmem:[%s4047_s2 + $0x50] sm:$0xff]  ;;  %vm194_vm1 = vcmask 64512   ;;  %s3431_s24 = smov 112   ;;  %s3432_s1 = smov 120  }
  0x16   :  { %v3523_v6 = vld [vmem:[%s4047_s2 + $0x38] sm:$0xff]  ;;  %v2958_v8 = vpack.c.bf16 %v50_v5, %v48_v3  ;;  %v52_v10 = vld [vmem:[%s4047_s2 + $0x30] sm:$0xff]  ;;  %v54_v11 = vld [vmem:[%s4047_s2 + $0x48] sm:$0xff]  ;;  %s3434_s25 = smov 96   ;;  %vm539_vm3 = vcmask 130048   ;;  %s3435_s26 = smov 64  }
  0x17   :  { %v2960_v9 = vpack.c.bf16 %v3528_v7, %v3523_v6  ;;  %2957 = vmatprep.subr.bf16.mxu1 %v2956_v4  ;;  %v2962_v12 = vpack.c.bf16 %v54_v11, %v52_v10  ;;  %v3541_v13 = vld [vmem:[%s4045_s0] sm:$0xff]  ;;  %v3548_v14 = vld [vmem:[%s4045_s0 + $0x8] sm:$0xff]  ;;  %v44_v15 = vld [vmem:[%s4045_s0 + $0x10] sm:$0xff]  ;;  %s3436_s13 = smov 16   ;;  %vm1012_vm4 = vcmask 195584   ;;  %s3438_s22 = smov 32  }
  0x18   :  { %2959 = vmatpush1.bf16.msra.mxu1 %v2958_v8  ;;  %v45_v16 = vld [vmem:[%s4045_s0 + $0x18] sm:$0xff]  ;;  %v2594_v17 = vld [vmem:[%s4050_s5] ss:$0 sm:$0xff]  ;;  %s3433_s0 = smov 104   ;;  %vm3589_vm2 = vmpackc.low %vm194_vm1, %vm194_vm1  ;;  %vm2295_vm5 = vcmask 523264   ;;  %s3439_s10 = smov [#allocation6]  }
  0x19   :  { %2961 = vmatprep.subr.bf16.mxu1 %v2960_v9  ;;  %v3623_v55 = vld [vmem:[#allocation2 + $0x8] sm:$0xff]  ;;  %v3625_v56 = vld [vmem:[#allocation2] sm:$0xff]  ;;  %s2559_s11 = sshll.u32 %s3439_s10, 4  ;;  %s2560_s11 = int_to_ptr.vmem [resolvable:$true] %s2559_s11 }
  0x1a   :  { %s3355_s12 = scalar_lea.vmem %s2560_s11, 1024  ;;  %p3360_p9 = scmp.lt.s32.totalorder %s2560_s11, %s2560_s11 }
  0x1b   :  { %p3356_p8 = scmp.ne.s32.totalorder %s2560_s11, %s3355_s12  ;;  %p3361_p10 = scmp.lt.s32.totalorder %s3355_s12, %s3355_s12 }
  0x1c   :  { %2963 = vmatpush1.bf16.msra.mxu1 %v2962_v12 }
  0x1d   :  { %p3362_p11 = por %p3361_p10, %p3360_p9 }
  0x1f   :  { %2590 = vmatmul.mubr.msk.f32.vlgmr.msra.gmra.mrb[0].mxu1 %vm56_vm0, %v3541_v13  ;;  %p3363_p12 = pnand %p3362_p11, %p3356_p8 }
  0x20   :  { %138 = vmatprep.mubr.f32.mxu1 %v3430_v0 }
  0x23   :  { %2591 = vmatmul.mubr.msk.f32.gmra.mrb[2].mxu1 %vm56_vm0, %v3548_v14 }
  0x24   :  { %143 = vmatprep.mubr.f32.mxu1 %v3430_v0 }
  0x27   :  { %2592 = vmatmul.mubr.msk.f32.gmra.mrb[4].mxu1 %vm56_vm0, %v44_v15 }
  0x28   :  { %149 = vmatprep.mubr.f32.mxu1 %v3430_v0 }
  0x2b   :  { %2593 = vmatmul.mubr.msk.f32.gmra.mrb[6].mxu1 %vm56_vm0, %v45_v16 }
  0xf2   :  { %v135_v18 = vpop.f32.mrb[0].mxu1 }
  0xf3   :  { %v161_v19 = vadd.f32 %v2594_v17, %v135_v18  ;;  %v137_v20 = vpop.f32.mrb[1].mxu1 }
  0xf5   :  { %182 = vrot.lane.b32.xlu1 %v161_v19, %s3431_s24  ;;  %178 = vrot.lane.b32.xlu0 %v161_v19, %s3432_s1 }
  0xf6   :  { %2769 = vmatprep.mubr.msk.f32.mxu1 %vm194_vm1, %v161_v19  ;;  %v140_v21 = vpop.f32.mrb[2].mxu1 }
  0xf7   :  { %v162_v22 = vadd.f32 %v2594_v17, %v140_v21  ;;  %v142_v23 = vpop.f32.mrb[3].mxu1 }
  0xf9   :  { %184 = vrot.lane.b32.xlu1 %v162_v22, %s3431_s24  ;;  %180 = vrot.lane.b32.xlu0 %v162_v22, %s3432_s1  ;;  %v3570_v24 = vpack.i.bf16 %v162_v22, %v161_v19 }
  0xfa   :  { %v3593_v38 = vpop.f32.mrb[4].mxu1 }
  0xfb   :  { %v3595_v40 = vpop.f32.mrb[5].mxu1 }
  0xfd   :  { %188 = vrot.lane.b32.xlu1 %v162_v22, %s3433_s0  ;;  %186 = vrot.lane.b32.xlu0 %v161_v19, %s3433_s0 }
  0xfe   :  { %v3597_v41 = vpop.f32.mrb[6].mxu1 }
  0xff   :  { %v3601_v42 = vpop.f32.mrb[7].mxu1 }
 0x101   :  { %3124 = vrot.lane.b32.xlu0 %v3570_v24, %s3434_s25 }
 0x167   :  { %v183_v25 = vpop.permute.xlu1 %182  ;;  %v179_v26 = vpop.permute.xlu0 %178 }
 0x168   :  { %2783 = vmatprep.mubr.msk.f32.mxu0 %vm194_vm1, %v183_v25 }
 0x16b   :  { %v185_v27 = vpop.permute.xlu1 %184  ;;  %v181_v28 = vpop.permute.xlu0 %180 }
 0x16c   :  { %v3575_v29 = vpack.i.bf16 %v185_v27, %v183_v25  ;;  %v3577_v30 = vpack.i.bf16 %v181_v28, %v179_v26 }
 0x16e   :  { %3134 = vrot.lane.b32.xlu0 %v3575_v29, %s3434_s25  ;;  %3129 = vrot.lane.b32.xlu1 %v3577_v30, %s3434_s25 }
 0x16f   :  { %v189_v31 = vpop.permute.xlu1 %188  ;;  %v187_v32 = vpop.permute.xlu0 %186 }
 0x170   :  { %v3583_v33 = vpack.i.bf16 %v189_v31, %v187_v32 }
 0x172   :  { %3139 = vrot.lane.b32.xlu1 %v3583_v33, %s3434_s25 }
 0x173   :  { %v3125_v34 = vpop.permute.xlu0 %3124 }
 0x174   :  { %v3127_v35 = vunpack.i.h.bf16 %v3125_v34  ;;  %v3126_v36 = vunpack.i.l.bf16 %v3125_v34 }
 0x176   :  { %v2964_v39 = vpack.c.bf16 %v3127_v35, %v3126_v36 }
 0x178   :  { %2966 = vmatprep.subr.msk.bf16.mxu1 %vm3589_vm2, %v2964_v39 }
 0x179   :  { %2969 = vmatpush3.bf16.xpose.msk.msra.mxu1 %vm3589_vm2, %v2964_v39 }
 0x180   :  { %2770 = vmatmul.mubr.msk.f32.vlgmr.msra.gmra.mrb[8].mxu1 %vm194_vm1, %v162_v22 }
 0x181   :  { %2776 = vmatprep.mubr.msk.f32.mxu1 %vm194_vm1, %v179_v26 }
 0x1e0   :  { %v3130_v43 = vpop.permute.xlu1 %3129  ;;  %v3135_v44 = vpop.permute.xlu0 %3134 }
 0x1e1   :  { %v3132_v45 = vunpack.i.h.bf16 %v3130_v43  ;;  %v3131_v46 = vunpack.i.l.bf16 %v3130_v43  ;;  %v3137_v47 = vunpack.i.h.bf16 %v3135_v44  ;;  %v3136_v48 = vunpack.i.l.bf16 %v3135_v44 }
 0x1e3   :  { %v2970_v49 = vpack.c.bf16 %v3132_v45, %v3131_v46  ;;  %v2976_v50 = vpack.c.bf16 %v3137_v47, %v3136_v48 }
 0x1e4   :  { %v3140_v51 = vpop.permute.xlu1 %3139 }
 0x1e5   :  { %v3142_v52 = vunpack.i.h.bf16 %v3140_v51  ;;  %v3141_v53 = vunpack.i.l.bf16 %v3140_v51  ;;  %2972 = vmatprep.subr.msk.bf16.mxu1 %vm3589_vm2, %v2970_v49  ;;  %2978 = vmatprep.subr.msk.bf16.mxu0 %vm3589_vm2, %v2976_v50 }
 0x1e6   :  { %2975 = vmatpush3.bf16.xpose.msk.msra.mxu1 %vm3589_vm2, %v2970_v49  ;;  %2981 = vmatpush3.bf16.xpose.msk.msra.mxu0 %vm3589_vm2, %v2976_v50 }
 0x1e7   :  { %v2982_v54 = vpack.c.bf16 %v3142_v52, %v3141_v53 }
 0x1e9   :  { %2984 = vmatprep.subr.msk.bf16.mxu1 %vm3589_vm2, %v2982_v54 }
 0x1ed   :  { %2777 = vmatmul.mubr.msk.f32.vlgmr.msra.gmra.mrb[10].mxu1 %vm194_vm1, %v181_v28  ;;  %2784 = vmatmul.mubr.msk.f32.vlgmr.msra.gmra.mrb[0].mxu0 %vm194_vm1, %v185_v27 }
 0x1ee   :  { %2987 = vmatpush3.bf16.xpose.msk.msra.mxu1 %vm3589_vm2, %v2982_v54  ;;  %2790 = vmatprep.mubr.msk.f32.mxu1 %vm194_vm1, %v187_v32 }
 0x1f5   :  { %2791 = vmatmul.mubr.msk.f32.vlgmr.msra.gmra.mrb[12].mxu1 %vm194_vm1, %v189_v31 }
 0x253   :  { %v2771_v57 = vpop.f32.mrb[8].mxu1 }
 0x254   :  { %v275_v58 = vadd.f32 %v2771_v57, %v3623_v55  ;;  %v269_v59 = vpop.f32.mrb[9].mxu1 }
 0x255   :  { %v270_v60 = vadd.f32 %v269_v59, %v3625_v56 }
 0x256   :  { %v543_v61 = vsel %vm539_vm3, %v275_v58, -inf }
 0x257   :  { %544 = vmax.xlane.f32.xlu1 %v543_v61  ;;  %v540_v62 = vsel %vm539_vm3, %v270_v60, -inf }
 0x258   :  { %541 = vmax.xlane.f32.xlu0 %v540_v62 }
 0x2c0   :  { %v2778_v63 = vpop.f32.mrb[10].mxu1  ;;  %v2785_v0 = vpop.f32.mrb[0].mxu0 }
 0x2c1   :  { %v362_v3 = vadd.f32 %v2778_v63, %v3623_v55  ;;  %v356_v4 = vpop.f32.mrb[11].mxu1  ;;  %v443_v5 = vpop.f32.mrb[1].mxu0  ;;  %v449_v12 = vadd.f32 %v2785_v0, %v3623_v55 }
 0x2c2   :  { %v444_v8 = vadd.f32 %v443_v5, %v3625_v56  ;;  %v357_v9 = vadd.f32 %v356_v4, %v3625_v56 }
 0x2c3   :  { %v549_v10 = vsel %vm539_vm3, %v362_v3, -inf  ;;  %v555_v20 = vsel %vm539_vm3, %v449_v12, -inf }
 0x2c4   :  { %550 = vmax.xlane.f32.xlu0 %v549_v10  ;;  %v552_v11 = vsel %vm539_vm3, %v444_v8, -inf  ;;  %v546_v15 = vsel %vm539_vm3, %v357_v9, -inf }
 0x2c5   :  { %553 = vmax.xlane.f32.xlu1 %v552_v11 }
 0x2c8   :  { %v2792_v16 = vpop.f32.mrb[12].mxu1  ;;  %547 = vmax.xlane.f32.xlu0 %v546_v15 }
 0x2c9   :  { %v530_v17 = vpop.f32.mrb[13].mxu1  ;;  %v536_v19 = vadd.f32 %v2792_v16, %v3623_v55 }
 0x2ca   :  { %v3639_v18 = vadd.f32 %v530_v17, %v3625_v56 }
 0x2cb   :  { %v561_v22 = vsel %vm539_vm3, %v536_v19, -inf }
 0x2cc   :  { %556 = vmax.xlane.f32.xlu0 %v555_v20  ;;  %v558_v21 = vsel %vm539_vm3, %v3639_v18, -inf }
 0x2cd   :  { %559 = vmax.xlane.f32.xlu1 %v558_v21 }
 0x2d0   :  { %562 = vmax.xlane.f32.xlu0 %v561_v22 }
 0x2de   :  { %3144 = vrot.lane.b32.xlu1 %v3570_v24, %s3435_s26 }
 0x2e4   :  { %v545_v23 = vpop.xlane.xlu1 %544 }
 0x2e5   :  { %v565_v25 = vsub.f32 %v275_v58, %v545_v23  ;;  %v542_v27 = vpop.xlane.xlu0 %541 }
 0x2e6   :  { %v564_v28 = vsub.f32 %v270_v60, %v542_v27 }
 0x2e7   :  { %v574_v26 = vmul.f32 1.442695, %v565_v25 }
 0x2e8   :  { %v572_v31 = vmul.f32 1.442695, %v564_v28 }
 0x2e9   :  { %3253 = vpow2.f32 %v574_v26 }
 0x2ea   :  { %3255 = vpow2.f32 %v572_v31 }
 0x2f3   :  { %v3254_v32 = vpop.eup %3253 }
 0x2f4   :  { %v591_v34 = vsel %vm539_vm3, %v3254_v32, 0.0  ;;  %v3256_v35 = vpop.eup %3255 }
 0x2f5   :  { %592 = vadd.xlane.f32.xlu0 %v591_v34  ;;  %v588_v36 = vsel %vm539_vm3, %v3256_v35, 0.0 }
 0x302   :  { %589 = vadd.xlane.f32.xlu1 %v588_v36 }
 0x351   :  { %v551_v39 = vpop.xlane.xlu0 %550 }
 0x352   :  { %v567_v43 = vsub.f32 %v362_v3, %v551_v39  ;;  %v554_v44 = vpop.xlane.xlu1 %553 }
 0x353   :  { %v568_v45 = vsub.f32 %v444_v8, %v554_v44 }
 0x354   :  { %v578_v24 = vmul.f32 1.442695, %v567_v43 }
 0x355   :  { %v548_v46 = vpop.xlane.xlu0 %547  ;;  %v580_v48 = vmul.f32 1.442695, %v568_v45 }
 0x356   :  { %3257 = vpow2.f32 %v578_v24  ;;  %v566_v47 = vsub.f32 %v357_v9, %v548_v46 }
 0x358   :  { %v576_v49 = vmul.f32 1.442695, %v566_v47 }
 0x359   :  { %v557_v50 = vpop.xlane.xlu0 %556 }
 0x35a   :  { %3259 = vpow2.f32 %v576_v49  ;;  %v569_v51 = vsub.f32 %v449_v12, %v557_v50  ;;  %v560_v52 = vpop.xlane.xlu1 %559 }
 0x35b   :  { %3261 = vpow2.f32 %v580_v48  ;;  %v570_v16 = vsub.f32 %v3639_v18, %v560_v52 }
 0x35c   :  { %v582_v53 = vmul.f32 1.442695, %v569_v51 }
 0x35d   :  { %v563_v54 = vpop.xlane.xlu0 %562 }
 0x35e   :  { %3263 = vpow2.f32 %v582_v53  ;;  %v571_v57 = vsub.f32 %v536_v19, %v563_v54  ;;  %v3145_v58 = vpop.permute.xlu1 %3144  ;;  %v584_v19 = vmul.f32 1.442695, %v570_v16 }
 0x35f   :  { %v3147_v59 = vunpack.i.h.bf16 %v3145_v58  ;;  %v3146_v60 = vunpack.i.l.bf16 %v3145_v58 }
 0x360   :  { %v3258_v61 = vpop.eup %3257  ;;  %v586_v62 = vmul.f32 1.442695, %v571_v57 }
 0x361   :  { %v2988_v63 = vpack.c.bf16 %v3147_v59, %v3146_v60  ;;  %v597_v0 = vsel %vm539_vm3, %v3258_v61, 0.0 }
 0x362   :  { %3265 = vpow2.f32 %v586_v62  ;;  %598 = vadd.xlane.f32.xlu0 %v597_v0  ;;  %v3682_v0 = vld [vmem:[%s4048_s3] sm:$0xff] }
 0x363   :  { %2989 = vmatprep.subr.bf16.mxu0 %v2988_v63 }
 0x364   :  { %v3260_v3 = vpop.eup %3259  ;;  %2991 = vmatpush3.bf16.msra.mxu0 %v2988_v63 }
 0x365   :  { %v594_v4 = vsel %vm539_vm3, %v3260_v3, 0.0  ;;  %v3262_v5 = vpop.eup %3261 }
 0x366   :  { %595 = vadd.xlane.f32.xlu1 %v594_v4  ;;  %v600_v9 = vsel %vm539_vm3, %v3262_v5, 0.0  ;;  %v3692_v4 = vld [vmem:[%s4048_s3 + $0x10] sm:$0xff] }
 0x368   :  { %v3264_v8 = vpop.eup %3263 }
 0x369   :  { %v603_v10 = vsel %vm539_vm3, %v3264_v8, 0.0 }
 0x36a   :  { %601 = vadd.xlane.f32.xlu1 %v600_v9  ;;  %604 = vadd.xlane.f32.xlu0 %v603_v10 }
 0x36c   :  { %v3266_v11 = vpop.eup %3265 }
 0x36d   :  { %v609_v12 = vsel %vm539_vm3, %v3266_v11, 0.0 }
 0x36e   :  { %610 = vadd.xlane.f32.xlu0 %v609_v12 }
 0x37b   :  { %3154 = vrot.lane.b32.xlu1 %v3575_v29, %s3435_s26 }
 0x382   :  { %v593_v15 = vpop.xlane.xlu0 %592 }
 0x383   :  { %3267 = vrcp.f32 %v593_v15 }
 0x384   :  { %3149 = vrot.lane.b32.xlu0 %v3577_v30, %s3435_s26 }
 0x38d   :  { %v3268_v17 = vpop.eup %3267 }
 0x38e   :  { %v621_v20 = vmul.f32 %v3268_v17, %v3254_v32 }
 0x38f   :  { %v590_v21 = vpop.xlane.xlu1 %589 }
 0x390   :  { %629 = vst.msk [vmem:[#allocation6 + $0x8] sm:$0xff] %vm539_vm3, %v621_v20  ;;  %3269 = vrcp.f32 %v590_v21 }
 0x391   :  { %3271 = vpow2.f32 %v584_v19 }
 0x39a   :  { %v3270_v22 = vpop.eup %3269 }
 0x39b   :  { %v3272_v23 = vpop.eup %3271  ;;  %v620_v25 = vmul.f32 %v3270_v22, %v3256_v35 }
 0x39c   :  { %v606_v29 = vsel %vm539_vm3, %v3272_v23, 0.0 }
 0x39d   :  { %628 = vst.msk [vmem:[#allocation6] sm:$0xff] %vm539_vm3, %v620_v25  ;;  %2797 = vmatprep.mubr.msk.f32.mxu0 %vm539_vm3, %v620_v25 }
 0x39e   :  { %2798 = vmatmul.mubr.msk.f32.vlgmr.msra.gmra.mrb[2].mxu0 %vm539_vm3, %v621_v20 }
 0x39f   :  { %607 = vadd.xlane.f32.xlu1 %v606_v29 }
 0x3b0   :  { %3159 = vrot.lane.b32.xlu1 %v3583_v33, %s3435_s26 }
 0x3ef   :  { %v599_v30 = vpop.xlane.xlu0 %598 }
 0x3f0   :  { %3273 = vrcp.f32 %v599_v30 }
 0x3f3   :  { %v596_v18 = vpop.xlane.xlu1 %595 }
 0x3f4   :  { %3275 = vrcp.f32 %v596_v18 }
 0x3f7   :  { %v602_v26 = vpop.xlane.xlu1 %601  ;;  %v605_v27 = vpop.xlane.xlu0 %604 }
 0x3f8   :  { %3277 = vrcp.f32 %v602_v26 }
 0x3f9   :  { %3279 = vrcp.f32 %v605_v27 }
 0x3fa   :  { %v3274_v28 = vpop.eup %3273 }
 0x3fb   :  { %v623_v31 = vmul.f32 %v3274_v28, %v3258_v61  ;;  %v3155_v32 = vpop.permute.xlu1 %3154  ;;  %v611_v34 = vpop.xlane.xlu0 %610 }
 0x3fc   :  { %v3157_v35 = vunpack.i.h.bf16 %v3155_v32  ;;  %v3156_v36 = vunpack.i.l.bf16 %v3155_v32  ;;  %3281 = vrcp.f32 %v611_v34 }
 0x3fd   :  { %631 = vst.msk [vmem:[#allocation6 + $0x18] sm:$0xff] %vm539_vm3, %v623_v31 }
 0x3fe   :  { %v3276_v39 = vpop.eup %3275  ;;  %v2996_v43 = vpack.c.bf16 %v3157_v35, %v3156_v36 }
 0x3ff   :  { %v3150_v33 = vpop.permute.xlu0 %3149  ;;  %v622_v44 = vmul.f32 %v3276_v39, %v3260_v3  ;;  %v3687_v3 = vld [vmem:[%s4048_s3 + $0x8] sm:$0xff] }
 0x400   :  { %v3152_v24 = vunpack.i.h.bf16 %v3150_v33  ;;  %v3151_v45 = vunpack.i.l.bf16 %v3150_v33  ;;  %2997 = vmatprep.subr.bf16.mxu0 %v2996_v43 }
 0x401   :  { %630 = vst.msk [vmem:[#allocation6 + $0x10] sm:$0xff] %vm539_vm3, %v622_v44  ;;  %2804 = vmatprep.mubr.msk.f32.mxu1 %vm539_vm3, %v622_v44  ;;  %2999 = vmatpush3.bf16.msra.mxu0 %v2996_v43 }
 0x402   :  { %v3278_v46 = vpop.eup %3277  ;;  %v2992_v47 = vpack.c.bf16 %v3152_v24, %v3151_v45  ;;  %v3163_v24 = vpack.i.bf16 %v3510_v2, %v3505_v1  ;;  %v3734_v45 = vld [vmem:[%s4050_s5 + $0x4] ss:$0 sm:$0xff] }
 0x403   :  { %v3280_v48 = vpop.eup %3279  ;;  %v624_v49 = vmul.f32 %v3278_v46, %v3262_v5  ;;  %v3004_v5 = vpack.c.bf16 %v3687_v3, %v3682_v0 }
 0x404   :  { %v625_v50 = vmul.f32 %v3280_v48, %v3264_v8  ;;  %2993 = vmatprep.subr.bf16.mxu1 %v2992_v47  ;;  %v3699_v8 = vld [vmem:[%s4048_s3 + $0x18] sm:$0xff]  ;;  %s3437_s3 = smov 24  }
 0x405   :  { %2995 = vmatpush3.bf16.msra.mxu1 %v2992_v47  ;;  %632 = vst.msk [vmem:[#allocation6 + $0x20] sm:$0xff] %vm539_vm3, %v624_v49  ;;  %2811 = vmatprep.mubr.msk.f32.mxu0 %vm539_vm3, %v624_v49  ;;  %v3008_v9 = vpack.c.bf16 %v3699_v8, %v3692_v4 }
 0x406   :  { %v3282_v51 = vpop.eup %3281  ;;  %633 = vst.msk [vmem:[#allocation6 + $0x28] sm:$0xff] %vm539_vm3, %v625_v50  ;;  %2812 = vmatmul.mubr.msk.f32.vlgmr.msra.gmra.mrb[4].mxu0 %vm539_vm3, %v625_v50  ;;  %3005 = vmatprep.subr.bf16.mxu0 %v3004_v5 }
 0x407   :  { %v627_v52 = vmul.f32 %v3282_v51, %v3266_v11  ;;  %3007 = vmatpush3.bf16.msra.mxu0 %v3004_v5 }
 0x408   :  { %2805 = vmatmul.mubr.msk.f32.vlgmr.msra.gmra.mrb[14].mxu1 %vm539_vm3, %v623_v31  ;;  %3009 = vmatprep.subr.bf16.mxu0 %v3008_v9  ;;  %v3720_v31 = vld [vmem:[%s4050_s5 + $0x3] ss:$0 sm:$0xff] }
 0x409   :  { %635 = vst.msk [vmem:[#allocation6 + $0x38] sm:$0xff] %vm539_vm3, %v627_v52 }
 0x40b   :  { %3011 = vmatpush3.bf16.msra.mxu0 %v3008_v9 }
 0x42c   :  { %v608_v53 = vpop.xlane.xlu1 %607 }
 0x42d   :  { %3283 = vrcp.f32 %v608_v53 }
 0x430   :  { %v3160_v54 = vpop.permute.xlu1 %3159 }
 0x431   :  { %v3162_v57 = vunpack.i.h.bf16 %v3160_v54  ;;  %v3161_v58 = vunpack.i.l.bf16 %v3160_v54 }
 0x433   :  { %v3000_v59 = vpack.c.bf16 %v3162_v57, %v3161_v58 }
 0x435   :  { %3001 = vmatprep.subr.bf16.mxu1 %v3000_v59 }
 0x436   :  { %3003 = vmatpush3.bf16.msra.mxu1 %v3000_v59 }
 0x437   :  { %v3284_v60 = vpop.eup %3283 }
 0x438   :  { %v626_v61 = vmul.f32 %v3284_v60, %v3272_v23 }
 0x43a   :  { %634 = vst.msk [vmem:[#allocation6 + $0x30] sm:$0xff] %vm539_vm3, %v626_v61  ;;  %2818 = vmatprep.mubr.msk.f32.mxu1 %vm539_vm3, %v626_v61 }
 0x43b   :  { %2819 = vmatmul.mubr.msk.f32.vlgmr.msra.gmra.mrb[16].mxu1 %vm539_vm3, %v627_v52 }
 0x471   :  { %v2799_v62 = vpop.f32.mrb[2].mxu0 }
 0x472   :  { %v714_v63 = vpop.f32.mrb[3].mxu0 }
 0x4d9   :  { %v2813_v10 = vpop.f32.mrb[4].mxu0 }
 0x4da   :  { %v888_v11 = vpop.f32.mrb[5].mxu0 }
 0x4db   :  { %v2806_v12 = vpop.f32.mrb[14].mxu1 }
 0x4dc   :  { %988 = vrot.lane.b32.xlu1 %v2806_v12, %s3429_s16  ;;  %v801_v15 = vpop.f32.mrb[15].mxu1  ;;  %v3168_v12 = vpack.i.bf16 %v3528_v7, %v3523_v6 }
 0x4dd   :  { %986 = vrot.lane.b32.xlu0 %v801_v15, %s3429_s16 }
 0x4e0   :  { %996 = vrot.lane.b32.xlu1 %v2813_v10, %s3436_s13 }
 0x4e1   :  { %994 = vrot.lane.b32.xlu0 %v888_v11, %s3436_s13 }
 0x50e   :  { %v2820_v16 = vpop.f32.mrb[16].mxu1 }
 0x50f   :  { %1004 = vrot.lane.b32.xlu1 %v2820_v16, %s3437_s3  ;;  %v975_v17 = vpop.f32.mrb[17].mxu1 }
 0x510   :  { %1002 = vrot.lane.b32.xlu0 %v975_v17, %s3437_s3 }
 0x54e   :  { %v989_v19 = vpop.permute.xlu1 %988 }
 0x54f   :  { %v987_v20 = vpop.permute.xlu0 %986  ;;  %v1009_v29 = vsel %vm194_vm1, %v2799_v62, %v989_v19 }
 0x550   :  { %v1008_v23 = vsel %vm194_vm1, %v714_v63, %v987_v20 }
 0x552   :  { %v997_v21 = vpop.permute.xlu1 %996 }
 0x553   :  { %v995_v22 = vpop.permute.xlu0 %994  ;;  %v1011_v26 = vsel %vm539_vm3, %v1009_v29, %v997_v21 }
 0x554   :  { %v1010_v30 = vsel %vm539_vm3, %v1008_v23, %v995_v22 }
 0x581   :  { %v1005_v25 = vpop.permute.xlu1 %1004 }
 0x582   :  { %v1003_v18 = vpop.permute.xlu0 %1002  ;;  %v1014_v28 = vsel %vm1012_vm4, %v1011_v26, %v1005_v25 }
 0x583   :  { %v1013_v27 = vsel %vm1012_vm4, %v1010_v30, %v1003_v18 }
 0x584   :  { %2829 = vmatprep.mubr.msk.f32.mxu0 %vm56_vm0, %v1013_v27 }
 0x585   :  { %2830 = vmatmul.mubr.msk.f32.vlgmr.msra.gmra.mrb[6].mxu0 %vm56_vm0, %v1014_v28 }
 0x658   :  { %v2831_v32 = vpop.f32.mrb[6].mxu0 }
 0x659   :  { %v1102_v34 = vadd.f32 %v2831_v32, %v3720_v31  ;;  %v1096_v35 = vpop.f32.mrb[7].mxu0 }
 0x65a   :  { %v1097_v36 = vadd.f32 %v3720_v31, %v1096_v35 }
 0x65b   :  { %v1106_v39 = vadd.f32 %v1102_v34, %v3548_v14 }
 0x65c   :  { %v1105_v43 = vadd.f32 %v1097_v36, %v3541_v13  ;;  %v2595_v13 = vld [vmem:[%s4050_s5 + $0x1] ss:$0 sm:$0xff] }
 0x65d   :  { %v1111_v33 = vsel %vm56_vm0, %v1106_v39, 0.0 }
 0x65e   :  { %1112 = vadd.xlane.f32.xlu1 %v1111_v33  ;;  %v1108_v44 = vsel %vm56_vm0, %v1105_v43, 0.0 }
 0x65f   :  { %1109 = vadd.xlane.f32.xlu0 %v1108_v44 }
 0x66f   :  { %3164 = vrot.lane.b32.xlu1 %v3163_v24, %s3434_s25 }
 0x673   :  { %1142 = vrot.lane.b32.xlu1 %v3734_v45, %s3434_s25 }
 0x677   :  { %169 = vrot.lane.b32.xlu1 %v2595_v13, %s3434_s25 }
 0x6eb   :  { %v1113_v14 = vpop.xlane.xlu1 %1112 }
 0x6ec   :  { %v1116_v46 = vmul.f32 0.03125, %v1113_v14  ;;  %v1110_v47 = vpop.xlane.xlu0 %1109 }
 0x6ed   :  { %v1115_v1 = vmul.f32 0.03125, %v1110_v47 }
 0x6ee   :  { %v1118_v2 = vsub.f32 %v1106_v39, %v1116_v46 }
 0x6ef   :  { %v1117_v48 = vsub.f32 %v1105_v43, %v1115_v1  ;;  %v3165_v49 = vpop.permute.xlu1 %3164 }
 0x6f0   :  { %v3167_v50 = vunpack.i.h.bf16 %v3165_v49  ;;  %v3166_v51 = vunpack.i.l.bf16 %v3165_v49  ;;  %v1120_v52 = vmul.f32 %v1118_v2, %v1118_v2 }
 0x6f1   :  { %v1119_v57 = vmul.f32 %v1117_v48, %v1117_v48 }
 0x6f2   :  { %v3012_v53 = vpack.c.bf16 %v3167_v50, %v3166_v51  ;;  %v1124_v54 = vsel %vm56_vm0, %v1120_v52, 0.0 }
 0x6f3   :  { %v1143_v58 = vpop.permute.xlu1 %1142  ;;  %1125 = vadd.xlane.f32.xlu0 %v1124_v54  ;;  %v1121_v59 = vsel %vm56_vm0, %v1119_v57, 0.0 }
 0x6f4   :  { %3013 = vmatprep.subr.bf16.mxu1 %v3012_v53 }
 0x6f5   :  { %3015 = vmatpush3.bf16.msra.mxu1 %v3012_v53 }
 0x6f7   :  { %v170_v60 = vpop.permute.xlu1 %169  ;;  %1122 = vadd.xlane.f32.xlu0 %v1121_v59 }
 0x6f8   :  { %v172_v61 = vadd.f32 %v170_v60, %v3593_v38  ;;  %v173_v62 = vadd.f32 %v170_v60, %v3595_v40  ;;  %v174_v63 = vadd.f32 %v170_v60, %v3597_v41  ;;  %v175_v5 = vadd.f32 %v170_v60, %v3601_v42 }
 0x6fa   :  { %v3178_v9 = vpack.i.bf16 %v174_v63, %v172_v61  ;;  %v3748_v10 = vpack.c.bf16 %v175_v5, %v173_v62  ;;  %v3750_v11 = vpack.i.bf16 %v175_v5, %v173_v62 }
 0x6fc   :  { %3179 = vrot.lane.b32.xlu1 %v3178_v9, %s3431_s24 }
 0x700   :  { %3189 = vrot.lane.b32.xlu1 %v3178_v9, %s3438_s22 }
 0x70d   :  { %3169 = vrot.lane.b32.xlu0 %v3168_v12, %s3434_s25 }
 0x711   :  { %3174 = vrot.lane.b32.xlu0 %v3178_v9, %s3432_s1 }
 0x715   :  { %3184 = vrot.lane.b32.xlu0 %v3178_v9, %s3433_s0 }
 0x76e   :  { %v3180_v38 = vpop.permute.xlu1 %3179 }
 0x76f   :  { %3199 = vrot.lane.b32.xlu1 %v3180_v38, %s3438_s22 }
 0x772   :  { %v3190_v40 = vpop.permute.xlu1 %3189 }
 0x773   :  { %v3192_v41 = vunpack.i.h.bf16 %v3190_v40  ;;  %v3191_v42 = vunpack.i.l.bf16 %v3190_v40 }
 0x775   :  { %v3020_v15 = vpack.c.bf16 %v3192_v41, %v3191_v42 }
 0x777   :  { %3022 = vmatprep.subr.msk.bf16.mxu0 %vm3589_vm2, %v3020_v15 }
 0x778   :  { %3025 = vmatpush3.bf16.xpose.msk.msra.mxu0 %vm3589_vm2, %v3020_v15 }
 0x780   :  { %v1126_v6 = vpop.xlane.xlu0 %1125 }
 0x781   :  { %v1128_v7 = vmul.f32 0.03125, %v1126_v6 }
 0x783   :  { %v1130_v16 = vadd.f32 1e-05, %v1128_v7 }
 0x784   :  { %v1123_v17 = vpop.xlane.xlu0 %1122 }
 0x785   :  { %3285 = vrsqrt.f32 %v1130_v16  ;;  %v1127_v19 = vmul.f32 0.03125, %v1123_v17 }
 0x787   :  { %v1129_v20 = vadd.f32 1e-05, %v1127_v19 }
 0x788   :  { %v3170_v21 = vpop.permute.xlu0 %3169 }
 0x789   :  { %3287 = vrsqrt.f32 %v1129_v20  ;;  %v3172_v22 = vunpack.i.h.bf16 %v3170_v21  ;;  %v3171_v23 = vunpack.i.l.bf16 %v3170_v21 }
 0x78b   :  { %v3016_v25 = vpack.c.bf16 %v3172_v22, %v3171_v23 }
 0x78c   :  { %v3175_v29 = vpop.permute.xlu0 %3174 }
 0x78d   :  { %3017 = vmatprep.subr.bf16.mxu1 %v3016_v25  ;;  %3194 = vrot.lane.b32.xlu0 %v3175_v29, %s3438_s22 }
 0x78e   :  { %3019 = vmatpush3.bf16.msra.mxu1 %v3016_v25 }
 0x78f   :  { %v3286_v30 = vpop.eup %3285 }
 0x790   :  { %v3185_v18 = vpop.permute.xlu0 %3184  ;;  %v1134_v26 = vmul.f32 %v3286_v30, %v1118_v2 }
 0x791   :  { %3204 = vrot.lane.b32.xlu0 %v3185_v18, %s3438_s22 }
 0x792   :  { %v1140_v32 = vmul.f32 %v3734_v45, %v1134_v26 }
 0x793   :  { %v3288_v27 = vpop.eup %3287 }
 0x794   :  { %v1133_v28 = vmul.f32 %v3288_v27, %v1117_v48  ;;  %v3770_v36 = vadd.f32 %v1143_v58, %v1140_v32  ;;  %v2624_v48 = vld [vmem:[%s4050_s5 + $0x2] ss:$0 sm:$0xff] }
 0x796   :  { %v1139_v34 = vmul.f32 %v3734_v45, %v1133_v28 }
 0x798   :  { %v3768_v35 = vadd.f32 %v1143_v58, %v1139_v34 }
 0x79a   :  { %2840 = vmatprep.mubr.msk.f32.mxu1 %vm56_vm0, %v3768_v35 }
 0x79b   :  { %2841 = vmatmul.mubr.msk.f32.vlgmr.msra.gmra.mrb[18].mxu1 %vm56_vm0, %v3770_v36 }
 0x7e1   :  { %v3200_v39 = vpop.permute.xlu1 %3199 }
 0x7e2   :  { %v3202_v43 = vunpack.i.h.bf16 %v3200_v39  ;;  %v3201_v33 = vunpack.i.l.bf16 %v3200_v39 }
 0x7e4   :  { %v3032_v44 = vpack.c.bf16 %v3202_v43, %v3201_v33 }
 0x7e6   :  { %3034 = vmatprep.subr.msk.bf16.mxu0 %vm3589_vm2, %v3032_v44 }
 0x7ff   :  { %v3195_v24 = vpop.permute.xlu0 %3194 }
 0x800   :  { %v3197_v13 = vunpack.i.h.bf16 %v3195_v24  ;;  %v3196_v45 = vunpack.i.l.bf16 %v3195_v24 }
 0x802   :  { %v3026_v14 = vpack.c.bf16 %v3197_v13, %v3196_v45 }
 0x803   :  { %v3205_v46 = vpop.permute.xlu0 %3204 }
 0x804   :  { %v3207_v47 = vunpack.i.h.bf16 %v3205_v46  ;;  %v3206_v1 = vunpack.i.l.bf16 %v3205_v46  ;;  %3028 = vmatprep.subr.msk.bf16.mxu1 %vm3589_vm2, %v3026_v14 }
 0x805   :  { %3031 = vmatpush3.bf16.xpose.msk.msra.mxu1 %vm3589_vm2, %v3026_v14 }
 0x806   :  { %v3038_v2 = vpack.c.bf16 %v3207_v47, %v3206_v1 }
 0x808   :  { %3040 = vmatprep.subr.msk.bf16.mxu1 %vm3589_vm2, %v3038_v2 }
 0x86e   :  { %v2842_v49 = vpop.f32.mrb[18].mxu1 }
 0x86f   :  { %v1250_v50 = vadd.f32 %v2842_v49, %v2624_v48  ;;  %v1244_v51 = vpop.f32.mrb[19].mxu1 }
 0x870   :  { %v1245_v52 = vadd.f32 %v2624_v48, %v1244_v51 }
 0x871   :  { %1257 = vrot.lane.b32.xlu0 %v1250_v50, %s3432_s1 }
 0x872   :  { %1255 = vrot.lane.b32.xlu1 %v1245_v52, %s3432_s1  ;;  %2847 = vmatprep.mubr.msk.f32.mxu0 %vm194_vm1, %v1245_v52 }
 0x873   :  { %2848 = vmatmul.mubr.msk.f32.vlgmr.msra.gmra.mrb[8].mxu0 %vm194_vm1, %v1250_v50 }
 0x874   :  { %3037 = vmatpush3.bf16.xpose.msk.msra.mxu0 %vm3589_vm2, %v3032_v44 }
 0x875   :  { %3045 = vmatprep.subr.bf16.mxu0 %v3748_v10  ;;  %1261 = vrot.lane.b32.xlu0 %v1250_v50, %s3431_s24 }
 0x876   :  { %1259 = vrot.lane.b32.xlu1 %v1245_v52, %s3431_s24 }
 0x879   :  { %1265 = vrot.lane.b32.xlu0 %v1250_v50, %s3433_s0 }
 0x87a   :  { %1263 = vrot.lane.b32.xlu1 %v1245_v52, %s3433_s0 }
 0x87d   :  { %1309 = vrot.lane.b32.xlu0 %v3623_v55, %s3431_s24 }
 0x87e   :  { %1307 = vrot.lane.b32.xlu1 %v3625_v56, %s3431_s24 }
 0x8e3   :  { %v1258_v53 = vpop.permute.xlu0 %1257 }
 0x8e4   :  { %v1256_v54 = vpop.permute.xlu1 %1255 }
 0x8e5   :  { %2854 = vmatprep.mubr.msk.f32.mxu1 %vm194_vm1, %v1256_v54 }
 0x8e6   :  { %2855 = vmatmul.mubr.msk.f32.vlgmr.msra.gmra.mrb[20].mxu1 %vm194_vm1, %v1258_v53 }
 0x8e7   :  { %3043 = vmatpush3.bf16.xpose.msk.msra.mxu1 %vm3589_vm2, %v3038_v2  ;;  %v1262_v57 = vpop.permute.xlu0 %1261 }
 0x8e8   :  { %v1260_v58 = vpop.permute.xlu1 %1259 }
 0x8e9   :  { %2861 = vmatprep.mubr.msk.f32.mxu0 %vm194_vm1, %v1260_v58 }
 0x8ea   :  { %2862 = vmatmul.mubr.msk.f32.vlgmr.msra.gmra.mrb[10].mxu0 %vm194_vm1, %v1262_v57 }
 0x8eb   :  { %3047 = vmatpush3.bf16.msra.mxu0 %v3748_v10  ;;  %v1266_v59 = vpop.permute.xlu0 %1265 }
 0x8ec   :  { %v1264_v55 = vpop.permute.xlu1 %1263 }
 0x8ed   :  { %2868 = vmatprep.mubr.msk.f32.mxu1 %vm194_vm1, %v1264_v55 }
 0x8ee   :  { %2869 = vmatmul.mubr.msk.f32.vlgmr.msra.gmra.mrb[22].mxu1 %vm194_vm1, %v1266_v59 }
 0x8ef   :  { %v1310_v56 = vpop.permute.xlu0 %1309 }
 0x8f0   :  { %v1308_v60 = vpop.permute.xlu1 %1307 }
 0x946   :  { %v2849_v61 = vpop.f32.mrb[8].mxu0 }
 0x947   :  { %v1393_v62 = vadd.f32 %v2849_v61, %v1310_v56  ;;  %v1387_v37 = vpop.f32.mrb[9].mxu0 }
 0x948   :  { %v1388_v63 = vadd.f32 %v1387_v37, %v1308_v60 }
 0x949   :  { %v1660_v5 = vsel %vm539_vm3, %v1393_v62, -inf }
 0x94a   :  { %1661 = vmax.xlane.f32.xlu0 %v1660_v5  ;;  %v1657_v9 = vsel %vm539_vm3, %v1388_v63, -inf }
 0x94b   :  { %1658 = vmax.xlane.f32.xlu1 %v1657_v9 }
 0x9b9   :  { %v2856_v12 = vpop.f32.mrb[20].mxu1 }
 0x9ba   :  { %v1480_v10 = vadd.f32 %v2856_v12, %v1310_v56  ;;  %v1474_v38 = vpop.f32.mrb[21].mxu1 }
 0x9bb   :  { %v1475_v40 = vadd.f32 %v1474_v38, %v1308_v60 }
 0x9bc   :  { %v1666_v41 = vsel %vm539_vm3, %v1480_v10, -inf }
 0x9bd   :  { %v2863_v42 = vpop.f32.mrb[10].mxu0  ;;  %1667 = vmax.xlane.f32.xlu1 %v1666_v41  ;;  %v1663_v15 = vsel %vm539_vm3, %v1475_v40, -inf }
 0x9be   :  { %v1567_v6 = vadd.f32 %v2863_v42, %v1310_v56  ;;  %1664 = vmax.xlane.f32.xlu0 %v1663_v15  ;;  %v1561_v7 = vpop.f32.mrb[11].mxu0 }
 0x9bf   :  { %v1562_v16 = vadd.f32 %v1561_v7, %v1308_v60  ;;  %v3223_v7 = vpack.i.bf16 %v3687_v3, %v3682_v0 }
 0x9c0   :  { %v1672_v17 = vsel %vm539_vm3, %v1567_v6, -inf }
 0x9c1   :  { %v2870_v19 = vpop.f32.mrb[22].mxu1  ;;  %1673 = vmax.xlane.f32.xlu1 %v1672_v17  ;;  %v1669_v20 = vsel %vm539_vm3, %v1562_v16, -inf }
 0x9c2   :  { %v1654_v21 = vadd.f32 %v2870_v19, %v1310_v56  ;;  %v1648_v22 = vpop.f32.mrb[23].mxu1  ;;  %1670 = vmax.xlane.f32.xlu0 %v1669_v20 }
 0x9c3   :  { %v1649_v23 = vadd.f32 %v1648_v22, %v1308_v60 }
 0x9c4   :  { %v1678_v25 = vsel %vm539_vm3, %v1654_v21, -inf }
 0x9c5   :  { %1679 = vmax.xlane.f32.xlu1 %v1678_v25  ;;  %v1675_v29 = vsel %vm539_vm3, %v1649_v23, -inf }
 0x9c6   :  { %1676 = vmax.xlane.f32.xlu0 %v1675_v29 }
 0x9d7   :  { %v1662_v30 = vpop.xlane.xlu0 %1661 }
 0x9d8   :  { %v1682_v18 = vsub.f32 %v1393_v62, %v1662_v30  ;;  %v1659_v26 = vpop.xlane.xlu1 %1658 }
 0x9d9   :  { %v1681_v27 = vsub.f32 %v1388_v63, %v1659_v26 }
 0x9da   :  { %v1691_v28 = vmul.f32 1.442695, %v1682_v18 }
 0x9db   :  { %v1689_v32 = vmul.f32 1.442695, %v1681_v27 }
 0x9dc   :  { %3289 = vpow2.f32 %v1691_v28 }
 0x9dd   :  { %3291 = vpow2.f32 %v1689_v32 }
 0x9e6   :  { %v3290_v34 = vpop.eup %3289 }
 0x9e7   :  { %v3292_v39 = vpop.eup %3291  ;;  %v1708_v43 = vsel %vm539_vm3, %v3290_v34, 0.0 }
 0x9e8   :  { %1709 = vadd.xlane.f32.xlu1 %v1708_v43  ;;  %v1705_v33 = vsel %vm539_vm3, %v3292_v39, 0.0 }
 0x9e9   :  { %1706 = vadd.xlane.f32.xlu0 %v1705_v33 }
 0xa4a   :  { %v1668_v44 = vpop.xlane.xlu1 %1667 }
 0xa4b   :  { %v1684_v24 = vsub.f32 %v1480_v10, %v1668_v44  ;;  %v1665_v13 = vpop.xlane.xlu0 %1664 }
 0xa4c   :  { %v1683_v45 = vsub.f32 %v1475_v40, %v1665_v13 }
 0xa4d   :  { %v1695_v14 = vmul.f32 1.442695, %v1684_v24 }
 0xa4e   :  { %v1693_v46 = vmul.f32 1.442695, %v1683_v45  ;;  %v1674_v47 = vpop.xlane.xlu1 %1673 }
 0xa4f   :  { %3293 = vpow2.f32 %v1695_v14  ;;  %v1686_v1 = vsub.f32 %v1567_v6, %v1674_v47  ;;  %v1671_v2 = vpop.xlane.xlu0 %1670 }
 0xa50   :  { %3295 = vpow2.f32 %v1693_v46  ;;  %v1685_v48 = vsub.f32 %v1562_v16, %v1671_v2  ;;  %v3228_v16 = vpack.i.bf16 %v3699_v8, %v3692_v4 }
 0xa51   :  { %v1699_v49 = vmul.f32 1.442695, %v1686_v1 }
 0xa52   :  { %v1697_v50 = vmul.f32 1.442695, %v1685_v48  ;;  %v1680_v51 = vpop.xlane.xlu1 %1679 }
 0xa53   :  { %3297 = vpow2.f32 %v1699_v49  ;;  %v1688_v52 = vsub.f32 %v1654_v21, %v1680_v51  ;;  %v1677_v53 = vpop.xlane.xlu0 %1676 }
 0xa54   :  { %3299 = vpow2.f32 %v1697_v50  ;;  %v1687_v54 = vsub.f32 %v1649_v23, %v1677_v53 }
 0xa55   :  { %v1703_v57 = vmul.f32 1.442695, %v1688_v52 }
 0xa56   :  { %v1701_v58 = vmul.f32 1.442695, %v1687_v54 }
 0xa57   :  { %3301 = vpow2.f32 %v1703_v57 }
 0xa58   :  { %3303 = vpow2.f32 %v1701_v58 }
 0xa59   :  { %v3294_v55 = vpop.eup %3293 }
 0xa5a   :  { %v3296_v59 = vpop.eup %3295  ;;  %v1714_v56 = vsel %vm539_vm3, %v3294_v55, 0.0 }
 0xa5b   :  { %1715 = vadd.xlane.f32.xlu1 %v1714_v56  ;;  %v1711_v60 = vsel %vm539_vm3, %v3296_v59, 0.0 }
 0xa5c   :  { %1712 = vadd.xlane.f32.xlu0 %v1711_v60 }
 0xa5d   :  { %v3298_v61 = vpop.eup %3297 }
 0xa5e   :  { %v3823_v62 = vpop.eup %3299  ;;  %v1720_v37 = vsel %vm539_vm3, %v3298_v61, 0.0 }
 0xa5f   :  { %1721 = vadd.xlane.f32.xlu1 %v1720_v37  ;;  %v1717_v63 = vsel %vm539_vm3, %v3823_v62, 0.0 }
 0xa60   :  { %1718 = vadd.xlane.f32.xlu0 %v1717_v63 }
 0xa61   :  { %v3828_v5 = vpop.eup %3301 }
 0xa62   :  { %v3830_v9 = vpop.eup %3303  ;;  %v1726_v12 = vsel %vm539_vm3, %v3828_v5, 0.0 }
 0xa63   :  { %1727 = vadd.xlane.f32.xlu1 %v1726_v12  ;;  %v1723_v10 = vsel %vm539_vm3, %v3830_v9, 0.0 }
 0xa64   :  { %1724 = vadd.xlane.f32.xlu0 %v1723_v10 }
 0xa74   :  { %3214 = vrot.lane.b32.xlu1 %v3750_v11, %s3431_s24 }
 0xa75   :  { %v1710_v38 = vpop.xlane.xlu1 %1709 }
 0xa76   :  { %3305 = vrcp.f32 %v1710_v38  ;;  %v1707_v40 = vpop.xlane.xlu0 %1706 }
 0xa77   :  { %3307 = vrcp.f32 %v1707_v40 }
 0xa78   :  { %3219 = vrot.lane.b32.xlu1 %v3750_v11, %s3433_s0 }
 0xa7a   :  { %3209 = vrot.lane.b32.xlu0 %v3750_v11, %s3432_s1 }
 0xa7c   :  { %3229 = vrot.lane.b32.xlu1 %v3228_v16, %s3434_s25 }
 0xa7e   :  { %3224 = vrot.lane.b32.xlu0 %v3223_v7, %s3434_s25 }
 0xa80   :  { %v3306_v41 = vpop.eup %3305 }
 0xa81   :  { %v3308_v42 = vpop.eup %3307  ;;  %v1738_v15 = vmul.f32 %v3306_v41, %v3290_v34 }
 0xa82   :  { %v1737_v6 = vmul.f32 %v3308_v42, %v3292_v39 }
 0xa83   :  { %1746 = vst.msk [vmem:[#allocation8 + $0x8] sm:$0xff] %vm539_vm3, %v1738_v15 }
 0xa84   :  { %1745 = vst.msk [vmem:[#allocation8] sm:$0xff] %vm539_vm3, %v1737_v6  ;;  %2875 = vmatprep.mubr.msk.f32.mxu0 %vm539_vm3, %v1737_v6 }
 0xa85   :  { %2876 = vmatmul.mubr.msk.f32.vlgmr.msra.gmra.mrb[12].mxu0 %vm539_vm3, %v1738_v15 }
 0xae8   :  { %v1716_v11 = vpop.xlane.xlu1 %1715 }
 0xae9   :  { %3309 = vrcp.f32 %v1716_v11  ;;  %v1713_v17 = vpop.xlane.xlu0 %1712 }
 0xaea   :  { %3311 = vrcp.f32 %v1713_v17 }
 0xaec   :  { %v1722_v19 = vpop.xlane.xlu1 %1721 }
 0xaed   :  { %3313 = vrcp.f32 %v1722_v19  ;;  %v1719_v20 = vpop.xlane.xlu0 %1718 }
 0xaee   :  { %3315 = vrcp.f32 %v1719_v20 }
 0xaf0   :  { %v1728_v21 = vpop.xlane.xlu1 %1727 }
 0xaf1   :  { %3317 = vrcp.f32 %v1728_v21  ;;  %v1725_v22 = vpop.xlane.xlu0 %1724 }
 0xaf2   :  { %3319 = vrcp.f32 %v1725_v22 }
 0xaf3   :  { %v3310_v0 = vpop.eup %3309 }
 0xaf4   :  { %v3312_v3 = vpop.eup %3311  ;;  %v1740_v23 = vmul.f32 %v3310_v0, %v3294_v55  ;;  %v3215_v4 = vpop.permute.xlu1 %3214  ;;  %v2260_v0 = vld [vmem:[%s4047_s2 + $0x20] sm:$0xff] }
 0xaf5   :  { %v3217_v8 = vunpack.i.h.bf16 %v3215_v4  ;;  %v3216_v25 = vunpack.i.l.bf16 %v3215_v4  ;;  %v3210_v29 = vpop.permute.xlu0 %3209  ;;  %v1739_v30 = vmul.f32 %v3312_v3, %v3296_v59  ;;  %v2261_v3 = vld [vmem:[%s4047_s2 + $0x28] sm:$0xff]  ;;  %v2262_v4 = vld [vmem:[%s4047_s2 + $0x38] sm:$0xff] }
 0xaf6   :  { %1748 = vst.msk [vmem:[#allocation8 + $0x18] sm:$0xff] %vm539_vm3, %v1740_v23  ;;  %v3212_v18 = vunpack.i.h.bf16 %v3210_v29  ;;  %v3211_v26 = vunpack.i.l.bf16 %v3210_v29 }
 0xaf7   :  { %v3314_v27 = vpop.eup %3313  ;;  %v3052_v28 = vpack.c.bf16 %v3217_v8, %v3216_v25  ;;  %1747 = vst.msk [vmem:[#allocation8 + $0x10] sm:$0xff] %vm539_vm3, %v1739_v30  ;;  %2882 = vmatprep.mubr.msk.f32.mxu1 %vm539_vm3, %v1739_v30  ;;  %v2263_v8 = vld [vmem:[%s4047_s2 + $0x40] sm:$0xff] }
 0xaf8   :  { %v3316_v32 = vpop.eup %3315  ;;  %v1742_v34 = vmul.f32 %v3314_v27, %v3298_v61  ;;  %v3048_v39 = vpack.c.bf16 %v3212_v18, %v3211_v26  ;;  %v3220_v43 = vpop.permute.xlu1 %3219  ;;  %v3243_v29 = vpack.i.bf16 %v2263_v8, %v2262_v4  ;;  %v2412_v4 = vld [vmem:[%s4049_s4 + $0x48] sm:$0xff] }
 0xaf9   :  { %v3222_v33 = vunpack.i.h.bf16 %v3220_v43  ;;  %v3221_v44 = vunpack.i.l.bf16 %v3220_v43  ;;  %3053 = vmatprep.subr.bf16.mxu0 %v3052_v28  ;;  %v1741_v24 = vmul.f32 %v3316_v32, %v3823_v62  ;;  %v3225_v48 = vpop.permute.xlu0 %3224 }
 0xafa   :  { %1750 = vst.msk [vmem:[#allocation8 + $0x28] sm:$0xff] %vm539_vm3, %v1742_v34  ;;  %3049 = vmatprep.subr.bf16.mxu1 %v3048_v39  ;;  %3055 = vmatpush3.bf16.msra.mxu0 %v3052_v28  ;;  %v3227_v50 = vunpack.i.h.bf16 %v3225_v48  ;;  %v3226_v51 = vunpack.i.l.bf16 %v3225_v48  ;;  %v2654_v48 = vld [vmem:[%s4050_s5 + $0x5] ss:$0 sm:$0xff] }
 0xafb   :  { %v3318_v13 = vpop.eup %3317  ;;  %v3056_v45 = vpack.c.bf16 %v3222_v33, %v3221_v44  ;;  %3051 = vmatpush3.bf16.msra.mxu1 %v3048_v39  ;;  %1749 = vst.msk [vmem:[#allocation8 + $0x20] sm:$0xff] %vm539_vm3, %v1741_v24  ;;  %2889 = vmatprep.mubr.msk.f32.mxu0 %vm539_vm3, %v1741_v24 }
 0xafc   :  { %v3320_v14 = vpop.eup %3319  ;;  %v1744_v46 = vmul.f32 %v3318_v13, %v3828_v5  ;;  %v3230_v49 = vpop.permute.xlu1 %3229  ;;  %v3060_v54 = vpack.c.bf16 %v3227_v50, %v3226_v51  ;;  %v2265_v50 = vld [vmem:[%s4047_s2 + $0x58] sm:$0xff] }
 0xafd   :  { %2890 = vmatmul.mubr.msk.f32.vlgmr.msra.gmra.mrb[14].mxu0 %vm539_vm3, %v1742_v34  ;;  %3057 = vmatprep.subr.bf16.mxu1 %v3056_v45  ;;  %v1743_v47 = vmul.f32 %v3320_v14, %v3830_v9  ;;  %v3232_v52 = vunpack.i.h.bf16 %v3230_v49  ;;  %v3231_v53 = vunpack.i.l.bf16 %v3230_v49  ;;  %v2264_v49 = vld [vmem:[%s4047_s2 + $0x50] sm:$0xff] }
 0xafe   :  { %1752 = vst.msk [vmem:[#allocation8 + $0x38] sm:$0xff] %vm539_vm3, %v1744_v46  ;;  %2883 = vmatmul.mubr.msk.f32.vlgmr.msra.gmra.mrb[24].mxu1 %vm539_vm3, %v1740_v23  ;;  %3061 = vmatprep.subr.bf16.mxu0 %v3060_v54  ;;  %v3238_v23 = vpack.i.bf16 %v2261_v3, %v2260_v0  ;;  %v3248_v51 = vpack.i.bf16 %v2265_v50, %v2264_v49  ;;  %v2409_v3 = vld [vmem:[%s4049_s4 + $0x30] sm:$0xff] }
 0xaff   :  { %3059 = vmatpush3.bf16.msra.mxu1 %v3056_v45  ;;  %1751 = vst.msk [vmem:[#allocation8 + $0x30] sm:$0xff] %vm539_vm3, %v1743_v47  ;;  %2896 = vmatprep.mubr.msk.f32.mxu1 %vm539_vm3, %v1743_v47  ;;  %v3064_v57 = vpack.c.bf16 %v3232_v52, %v3231_v53  ;;  %v2403_v52 = vld [vmem:[%s4049_s4] sm:$0xff]  ;;  %v2404_v53 = vld [vmem:[%s4049_s4 + $0x8] sm:$0xff] }
 0xb00   :  { %3063 = vmatpush3.bf16.msra.mxu0 %v3060_v54  ;;  %v3076_v54 = vpack.c.bf16 %v2404_v53, %v2403_v52 }
 0xb01   :  { %3065 = vmatprep.subr.bf16.mxu0 %v3064_v57 }
 0xb02   :  { %2897 = vmatmul.mubr.msk.f32.vlgmr.msra.gmra.mrb[26].mxu1 %vm539_vm3, %v1744_v46 }
 0xb04   :  { %3067 = vmatpush3.bf16.msra.mxu0 %v3064_v57 }
 0xb05   :  { %3077 = vmatprep.subr.bf16.mxu0 %v3076_v54 }
 0xb58   :  { %v2877_v1 = vpop.f32.mrb[12].mxu0 }
 0xb59   :  { %v1825_v2 = vpop.f32.mrb[13].mxu0 }
 0xbd0   :  { %v2891_v58 = vpop.f32.mrb[14].mxu0 }
 0xbd1   :  { %v2884_v55 = vpop.f32.mrb[24].mxu1  ;;  %v1987_v59 = vpop.f32.mrb[15].mxu0 }
 0xbd2   :  { %2081 = vrot.lane.b32.xlu1 %v2884_v55, %s3429_s16  ;;  %v1906_v56 = vpop.f32.mrb[25].mxu1 }
 0xbd3   :  { %2079 = vrot.lane.b32.xlu0 %v1906_v56, %s3429_s16 }
 0xbd5   :  { %v2898_v60 = vpop.f32.mrb[26].mxu1 }
 0xbd6   :  { %v2068_v61 = vpop.f32.mrb[27].mxu1  ;;  %2089 = vrot.lane.b32.xlu1 %v2891_v58, %s3436_s13 }
 0xbd7   :  { %2087 = vrot.lane.b32.xlu0 %v1987_v59, %s3436_s13 }
 0xbda   :  { %2097 = vrot.lane.b32.xlu1 %v2898_v60, %s3437_s3 }
 0xbdb   :  { %2095 = vrot.lane.b32.xlu0 %v2068_v61, %s3437_s3 }
 0xbdf   :  { %2133 = vrot.lane.b32.xlu0 %v3720_v31, %s3434_s25 }
 0xc44   :  { %v2082_v62 = vpop.permute.xlu1 %2081 }
 0xc45   :  { %v2080_v37 = vpop.permute.xlu0 %2079  ;;  %v2102_v10 = vsel %vm194_vm1, %v2877_v1, %v2082_v62 }
 0xc46   :  { %v2101_v9 = vsel %vm194_vm1, %v1825_v2, %v2080_v37 }
 0xc48   :  { %v2090_v63 = vpop.permute.xlu1 %2089 }
 0xc49   :  { %v2088_v5 = vpop.permute.xlu0 %2087  ;;  %v2104_v41 = vsel %vm539_vm3, %v2102_v10, %v2090_v63 }
 0xc4a   :  { %v2103_v38 = vsel %vm539_vm3, %v2101_v9, %v2088_v5 }
 0xc4c   :  { %v2098_v12 = vpop.permute.xlu1 %2097 }
 0xc4d   :  { %v2096_v40 = vpop.permute.xlu0 %2095  ;;  %v2106_v15 = vsel %vm1012_vm4, %v2104_v41, %v2098_v12 }
 0xc4e   :  { %v2105_v42 = vsel %vm1012_vm4, %v2103_v38, %v2096_v40 }
 0xc4f   :  { %2907 = vmatprep.mubr.msk.f32.mxu0 %vm56_vm0, %v2105_v42 }
 0xc50   :  { %2908 = vmatmul.mubr.msk.f32.vlgmr.msra.gmra.mrb[16].mxu0 %vm56_vm0, %v2106_v15 }
 0xc51   :  { %v2134_v6 = vpop.permute.xlu0 %2133  ;;  %3079 = vmatpush3.bf16.msra.mxu0 %v3076_v54 }
 0xd23   :  { %v2909_v7 = vpop.f32.mrb[16].mxu0 }
 0xd24   :  { %v2214_v16 = vadd.f32 %v2909_v7, %v2134_v6  ;;  %v2208_v11 = vpop.f32.mrb[17].mxu0 }
 0xd25   :  { %v2209_v17 = vadd.f32 %v2208_v11, %v2134_v6 }
 0xd26   :  { %v2218_v19 = vadd.f32 %v2214_v16, %v3770_v36  ;;  %v2258_v36 = vld [vmem:[%s4047_s2 + $0x8] sm:$0xff] }
 0xd27   :  { %v2217_v20 = vadd.f32 %v2209_v17, %v3768_v35  ;;  %v2259_v35 = vld [vmem:[%s4047_s2 + $0x10] sm:$0xff] }
 0xd28   :  { %v2223_v21 = vsel %vm56_vm0, %v2218_v19, 0.0  ;;  %v3233_v25 = vpack.i.bf16 %v2259_v35, %v2258_v36  ;;  %v2405_v17 = vld [vmem:[%s4049_s4 + $0x10] sm:$0xff]  ;;  %v2411_v35 = vld [vmem:[%s4049_s4 + $0x40] sm:$0xff] }
 0xd29   :  { %2224 = vadd.xlane.f32.xlu0 %v2223_v21  ;;  %v2220_v22 = vsel %vm56_vm0, %v2217_v20, 0.0  ;;  %v2407_v21 = vld [vmem:[%s4049_s4 + $0x20] sm:$0xff]  ;;  %v3092_v8 = vpack.c.bf16 %v2412_v4, %v2411_v35 }
 0xd2a   :  { %2221 = vadd.xlane.f32.xlu1 %v2220_v22  ;;  %v2408_v22 = vld [vmem:[%s4049_s4 + $0x28] sm:$0xff] }
 0xd2b   :  { %v3084_v0 = vpack.c.bf16 %v2408_v22, %v2407_v21 }
 0xd3b   :  { %3239 = vrot.lane.b32.xlu1 %v3238_v23, %s3435_s26  ;;  %v2410_v23 = vld [vmem:[%s4049_s4 + $0x38] sm:$0xff] }
 0xd3c   :  { %v3088_v36 = vpack.c.bf16 %v2410_v23, %v2409_v3 }
 0xd3f   :  { %3234 = vrot.lane.b32.xlu0 %v3233_v25, %s3435_s26  ;;  %3244 = vrot.lane.b32.xlu1 %v3243_v29, %s3435_s26  ;;  %v2413_v25 = vld [vmem:[%s4049_s4 + $0x50] sm:$0xff]  ;;  %v2414_v29 = vld [vmem:[%s4049_s4 + $0x58] sm:$0xff] }
 0xdb6   :  { %v2225_v30 = vpop.xlane.xlu0 %2224 }
 0xdb7   :  { %v2227_v18 = vmul.f32 0.03125, %v2225_v30  ;;  %v2222_v26 = vpop.xlane.xlu1 %2221  ;;  %v3096_v30 = vpack.c.bf16 %v2414_v29, %v2413_v25 }
 0xdb8   :  { %v2226_v27 = vmul.f32 0.03125, %v2222_v26  ;;  %v2416_v26 = vld [vmem:[%s4049_s4 + $0x68] sm:$0xff] }
 0xdb9   :  { %v2229_v28 = vsub.f32 %v2218_v19, %v2227_v18  ;;  %v2406_v19 = vld [vmem:[%s4049_s4 + $0x18] sm:$0xff]  ;;  %v2415_v18 = vld [vmem:[%s4049_s4 + $0x60] sm:$0xff] }
 0xdba   :  { %v2228_v32 = vsub.f32 %v2217_v20, %v2226_v27  ;;  %v3235_v34 = vpop.permute.xlu0 %3234  ;;  %v3080_v20 = vpack.c.bf16 %v2406_v19, %v2405_v17  ;;  %v3100_v27 = vpack.c.bf16 %v2416_v26, %v2415_v18  ;;  %v2658_v19 = vld [vmem:[%s4050_s5 + $0x6] ss:$0 sm:$0xff] }
 0xdbb   :  { %v2231_v39 = vmul.f32 %v2229_v28, %v2229_v28  ;;  %v3237_v43 = vunpack.i.h.bf16 %v3235_v34  ;;  %v3236_v33 = vunpack.i.l.bf16 %v3235_v34  ;;  %v3240_v44 = vpop.permute.xlu1 %3239 }
 0xdbc   :  { %v2230_v24 = vmul.f32 %v2228_v32, %v2228_v32  ;;  %v3242_v13 = vunpack.i.h.bf16 %v3240_v44  ;;  %v3241_v45 = vunpack.i.l.bf16 %v3240_v44  ;;  %3081 = vmatprep.subr.bf16.mxu0 %v3080_v20 }
 0xdbd   :  { %v2235_v14 = vsel %vm56_vm0, %v2231_v39, 0.0  ;;  %v2296_v46 = vsel %vm2295_vm5, %v3236_v33, %v3237_v43  ;;  %3083 = vmatpush3.bf16.msra.mxu0 %v3080_v20  ;;  %v2655_v39 = vld [vmem:[%s4050_s5 + $0x7] ss:$0 sm:$0xff] }
 0xdbe   :  { %2236 = vadd.xlane.f32.xlu1 %v2235_v14  ;;  %v2232_v47 = vsel %vm56_vm0, %v2230_v24, 0.0  ;;  %v2297_v1 = vsel %vm2295_vm5, %v3241_v45, %v3242_v13  ;;  %3085 = vmatprep.subr.bf16.mxu0 %v3084_v0 }
 0xdbf   :  { %2233 = vadd.xlane.f32.xlu0 %v2232_v47  ;;  %v3068_v2 = vpack.c.bf16 %v2297_v1, %v2296_v46  ;;  %v3245_v57 = vpop.permute.xlu1 %3244 }
 0xdc0   :  { %v3247_v61 = vunpack.i.h.bf16 %v3245_v57  ;;  %v3246_v62 = vunpack.i.l.bf16 %v3245_v57 }
 0xdc1   :  { %3069 = vmatprep.subr.bf16.mxu1 %v3068_v2  ;;  %3087 = vmatpush3.bf16.msra.mxu0 %v3084_v0 }
 0xdc2   :  { %3071 = vmatpush3.bf16.msra.mxu1 %v3068_v2  ;;  %v2298_v9 = vsel %vm2295_vm5, %v3246_v62, %v3247_v61  ;;  %3089 = vmatprep.subr.bf16.mxu0 %v3088_v36 }
 0xdc5   :  { %3091 = vmatpush3.bf16.msra.mxu0 %v3088_v36 }
 0xdc6   :  { %3093 = vmatprep.subr.bf16.mxu0 %v3092_v8 }
 0xdc9   :  { %3095 = vmatpush3.bf16.msra.mxu0 %v3092_v8 }
 0xdca   :  { %3097 = vmatprep.subr.bf16.mxu0 %v3096_v30 }
 0xdcd   :  { %3099 = vmatpush3.bf16.msra.mxu0 %v3096_v30 }
 0xdce   :  { %3101 = vmatprep.subr.bf16.mxu0 %v3100_v27 }
 0xdcf   :  { %2253 = vrot.lane.b32.xlu1 %v2654_v48, %s3434_s25 }
 0xdd1   :  { %3103 = vmatpush3.bf16.msra.mxu0 %v3100_v27 }
 0xdd5   :  { %3249 = vrot.lane.b32.xlu0 %v3248_v51, %s3435_s26 }
 0xdd9   :  { %2419 = vrot.lane.b32.xlu0 %v3720_v31, %s3435_s26 }
 0xe4b   :  { %v2237_v58 = vpop.xlane.xlu1 %2236 }
 0xe4c   :  { %v2239_v55 = vmul.f32 0.03125, %v2237_v58  ;;  %v2234_v59 = vpop.xlane.xlu0 %2233 }
 0xe4d   :  { %v2238_v56 = vmul.f32 0.03125, %v2234_v59 }
 0xe4e   :  { %v2241_v60 = vadd.f32 1e-05, %v2239_v55 }
 0xe4f   :  { %v2240_v31 = vadd.f32 1e-05, %v2238_v56  ;;  %v2254_v6 = vpop.permute.xlu1 %2253 }
 0xe50   :  { %3321 = vrsqrt.f32 %v2241_v60  ;;  %v3250_v37 = vpop.permute.xlu0 %3249 }
 0xe51   :  { %3323 = vrsqrt.f32 %v2240_v31  ;;  %v3252_v63 = vunpack.i.h.bf16 %v3250_v37  ;;  %v3251_v5 = vunpack.i.l.bf16 %v3250_v37 }
 0xe53   :  { %v2299_v12 = vsel %vm2295_vm5, %v3251_v5, %v3252_v63 }
 0xe54   :  { %v3072_v10 = vpack.c.bf16 %v2299_v12, %v2298_v9  ;;  %v2420_v56 = vpop.permute.xlu0 %2419 }
 0xe56   :  { %3073 = vmatprep.subr.bf16.mxu1 %v3072_v10 }
 0xe57   :  { %3075 = vmatpush3.bf16.msra.mxu1 %v3072_v10 }
 0xe5a   :  { %v3322_v38 = vpop.eup %3321 }
 0xe5b   :  { %v3324_v40 = vpop.eup %3323  ;;  %v2245_v41 = vmul.f32 %v3322_v38, %v2229_v28  ;;  %v2417_v28 = vld [vmem:[%s4049_s4 + $0x70] sm:$0xff] }
 0xe5c   :  { %v2244_v42 = vmul.f32 %v3324_v40, %v2228_v32  ;;  %v2418_v32 = vld [vmem:[%s4049_s4 + $0x78] sm:$0xff] }
 0xe5d   :  { %v2251_v15 = vmul.f32 %v2654_v48, %v2245_v41  ;;  %v3104_v34 = vpack.c.bf16 %v2418_v32, %v2417_v28 }
 0xe5e   :  { %v2250_v7 = vmul.f32 %v2654_v48, %v2244_v42 }
 0xe5f   :  { %v3935_v11 = vadd.f32 %v2254_v6, %v2251_v15  ;;  %3105 = vmatprep.subr.bf16.mxu0 %v3104_v34 }
 0xe60   :  { %v3933_v16 = vadd.f32 %v2254_v6, %v2250_v7  ;;  %3107 = vmatpush3.bf16.msra.mxu0 %v3104_v34 }
 0xe62   :  { %2918 = vmatprep.mubr.msk.f32.mxu1 %vm56_vm0, %v3933_v16 }
 0xe63   :  { %2919 = vmatmul.mubr.msk.f32.vlgmr.msra.gmra.mrb[28].mxu1 %vm56_vm0, %v3935_v11 }
 0xf36   :  { %v2920_v43 = vpop.f32.mrb[28].mxu1 }
 0xf37   :  { %v2382_v33 = vadd.f32 %v2920_v43, %v2655_v39  ;;  %v2376_v44 = vpop.f32.mrb[29].mxu1 }
 0xf38   :  { %v2377_v24 = vadd.f32 %v2655_v39, %v2376_v44 }
 0xf39   :  { %v2388_v13 = vmul.f32 0.044715, %v2382_v33  ;;  %v2386_v58 = vmul.f32 0.5, %v2382_v33 }
 0xf3a   :  { %v2387_v45 = vmul.f32 0.044715, %v2377_v24  ;;  %v2385_v54 = vmul.f32 0.5, %v2377_v24 }
 0xf3b   :  { %v2390_v14 = vmul.f32 %v2388_v13, %v2382_v33 }
 0xf3c   :  { %v2389_v46 = vmul.f32 %v2387_v45, %v2377_v24 }
 0xf3d   :  { %v2392_v47 = vmul.f32 %v2390_v14, %v2382_v33 }
 0xf3e   :  { %v2391_v1 = vmul.f32 %v2389_v46, %v2377_v24 }
 0xf3f   :  { %v2394_v2 = vadd.f32 %v2392_v47, %v2382_v33 }
 0xf40   :  { %v2393_v48 = vadd.f32 %v2391_v1, %v2377_v24 }
 0xf41   :  { %v2396_v49 = vmul.f32 0.7978846, %v2394_v2 }
 0xf42   :  { %v2395_v50 = vmul.f32 0.7978846, %v2393_v48 }
 0xf43   :  { %3325 = vtanh.f32 %v2396_v49 }
 0xf44   :  { %3327 = vtanh.f32 %v2395_v50 }
 0xf4d   :  { %v3326_v51 = vpop.eup %3325 }
 0xf4e   :  { %v3328_v52 = vpop.eup %3327  ;;  %v2400_v53 = vadd.f32 1.0, %v3326_v51 }
 0xf4f   :  { %v2399_v57 = vadd.f32 1.0, %v3328_v52 }
 0xf50   :  { %v2402_v59 = vmul.f32 %v2400_v53, %v2386_v58 }
 0xf51   :  { %v2401_v55 = vmul.f32 %v2399_v57, %v2385_v54 }
 0xf53   :  { %2953 = vmatprep.mubr.f32.mxu0 %v2401_v55 }
 0xf54   :  { %2954 = vmatmul.mubr.f32.vlgmr.msra.gmra.mrb[18].mxu0 %v2402_v59 }
0x1027   :  { %v2955_v60 = vpop.f32.mrb[18].mxu0 }
0x1028   :  { %v2494_v61 = vadd.f32 %v2955_v60, %v2420_v56  ;;  %v2488_v62 = vpop.f32.mrb[19].mxu0 }
0x1029   :  { %v2489_v31 = vadd.f32 %v2488_v62, %v2420_v56 }
0x102a   :  { %v2498_v37 = vadd.f32 %v2494_v61, %v3935_v11 }
0x102b   :  { %v2497_v63 = vadd.f32 %v2489_v31, %v3933_v16 }
0x102c   :  { %v2503_v5 = vsel %vm56_vm0, %v2498_v37, 0.0 }
0x102d   :  { %2504 = vadd.xlane.f32.xlu0 %v2503_v5  ;;  %v2500_v9 = vsel %vm56_vm0, %v2497_v63, 0.0 }
0x102e   :  { %2501 = vadd.xlane.f32.xlu1 %v2500_v9 }
0x10ba   :  { %v2505_v12 = vpop.xlane.xlu0 %2504 }
0x10bb   :  { %v2507_v10 = vmul.f32 0.03125, %v2505_v12  ;;  %v2502_v38 = vpop.xlane.xlu1 %2501 }
0x10bc   :  { %v2506_v40 = vmul.f32 0.03125, %v2502_v38 }
0x10bd   :  { %v2509_v41 = vsub.f32 %v2498_v37, %v2507_v10 }
0x10be   :  { %v2508_v42 = vsub.f32 %v2497_v63, %v2506_v40 }
0x10bf   :  { %v2511_v15 = vmul.f32 %v2509_v41, %v2509_v41 }
0x10c0   :  { %v2510_v6 = vmul.f32 %v2508_v42, %v2508_v42 }
0x10c1   :  { %v2515_v7 = vsel %vm56_vm0, %v2511_v15, 0.0 }
0x10c2   :  { %2516 = vadd.xlane.f32.xlu1 %v2515_v7  ;;  %v2512_v17 = vsel %vm56_vm0, %v2510_v6, 0.0 }
0x10c3   :  { %2513 = vadd.xlane.f32.xlu0 %v2512_v17 }
0x10d9   :  { %2533 = vrot.lane.b32.xlu0 %v2658_v19, %s3434_s25 }
0x10da   :  { %3366 = shalt.err (!%p3363_p12)
}
0x10db   :  { %s3367_s14 = scalar_lea.hbm %s4052_s7, 1024 }
0x10dc   :  { %p3368_p13 = scmp.ne.s32.totalorder %s4052_s7, %s3367_s14  ;;  %p3371_p0 = scmp.lt.u32.totalorder %s3367_s14, %s4052_s7 }
0x10de   :  { %p3373_p1 = pnand %p3371_p0, %p3368_p13 }
0x10e0   :  { %3376 = shalt.err (!%p3373_p1)
}
0x10e1   :  { %2565 = dma.vmem_to_hbm [thread:$0]  %s2560_s11, 1024, %s4052_s7, [#allocation7], %s3428_s15, %s3428_s15, %s3429_s16  }
0x10e2   :  { %s3440_s21 = smov [#allocation8]  }
0x10e3   :  { %s2571_s22 = sshll.u32 %s3440_s21, 4  ;;  %s2572_s22 = int_to_ptr.vmem [resolvable:$true] %s2571_s22 }
0x10e4   :  { %s3377_s23 = scalar_lea.vmem %s2572_s22, 1024  ;;  %p3382_p3 = scmp.lt.s32.totalorder %s2572_s22, %s2572_s22 }
0x10e5   :  { %p3378_p2 = scmp.ne.s32.totalorder %s2572_s22, %s3377_s23  ;;  %p3383_p4 = scmp.lt.s32.totalorder %s3377_s23, %s3377_s23 }
0x10e7   :  { %p3384_p5 = por %p3383_p4, %p3382_p3 }
0x10e9   :  { %p3385_p6 = pnand %p3384_p5, %p3378_p2 }
0x10eb   :  { %3388 = shalt.err (!%p3385_p6)
}
0x10ec   :  { %s3389_s2 = scalar_lea.hbm %s4053_s8, 1024 }
0x10ed   :  { %p3390_p7 = scmp.ne.s32.totalorder %s4053_s8, %s3389_s2  ;;  %p3393_p8 = scmp.lt.u32.totalorder %s3389_s2, %s4053_s8 }
0x10ef   :  { %p3395_p9 = pnand %p3393_p8, %p3390_p7 }
0x10f1   :  { %3398 = shalt.err (!%p3395_p9)
}
0x10f2   :  { %2577 = dma.vmem_to_hbm [thread:$0]  %s2572_s22, 1024, %s4053_s8, [#allocation7], %s3428_s15, %s3428_s15, %s3429_s16  }
0x10f3   :  { %s3441_s30 = smov [#allocation5]  }
0x10f4   :  { %s2547_s4 = sshll.u32 %s3441_s30, 4  ;;  %s2548_s4 = int_to_ptr.vmem [resolvable:$true] %s2547_s4 }
0x10f5   :  { %s3399_s8 = scalar_lea.vmem %s2548_s4, 256  ;;  %p3404_p11 = scmp.lt.s32.totalorder %s2548_s4, %s2548_s4 }
0x10f6   :  { %p3400_p10 = scmp.ne.s32.totalorder %s2548_s4, %s3399_s8  ;;  %p3405_p12 = scmp.lt.s32.totalorder %s3399_s8, %s3399_s8 }
0x10f8   :  { %p3406_p13 = por %p3405_p12, %p3404_p11 }
0x10fa   :  { %p3407_p0 = pnand %p3406_p13, %p3400_p10 }
0x114f   :  { %v2517_v20 = vpop.xlane.xlu1 %2516 }
0x1150   :  { %v2519_v21 = vmul.f32 0.03125, %v2517_v20  ;;  %v2514_v22 = vpop.xlane.xlu0 %2513 }
0x1151   :  { %v2518_v0 = vmul.f32 0.03125, %v2514_v22 }
0x1152   :  { %v2521_v3 = vadd.f32 1e-05, %v2519_v21 }
0x1153   :  { %v2520_v23 = vadd.f32 1e-05, %v2518_v0 }
0x1154   :  { %3329 = vrsqrt.f32 %v2521_v3  ;;  %v2534_v25 = vpop.permute.xlu0 %2533 }
0x1155   :  { %3331 = vrsqrt.f32 %v2520_v23 }
0x115e   :  { %v3330_v36 = vpop.eup %3329 }
0x115f   :  { %v3332_v35 = vpop.eup %3331  ;;  %v2525_v4 = vmul.f32 %v3330_v36, %v2509_v41 }
0x1160   :  { %v2524_v8 = vmul.f32 %v3332_v35, %v2508_v42 }
0x1161   :  { %v2531_v29 = vmul.f32 %v2658_v19, %v2525_v4 }
0x1162   :  { %v2530_v30 = vmul.f32 %v2658_v19, %v2524_v8 }
0x1163   :  { %v2537_v18 = vadd.f32 %v2534_v25, %v2531_v29 }
0x1164   :  { %v2536_v26 = vadd.f32 %v2534_v25, %v2530_v30 }
0x1165   :  { %v2539_v27 = vadd.f32 %v2537_v18, %v3935_v11 }
0x1166   :  { %v2538_v28 = vadd.f32 %v2536_v26, %v3933_v16 }
0x1167   :  { %2541 = vst.msk [vmem:[#allocation5 + $0x8] sm:$0xff] %vm56_vm0, %v2539_v27 }
0x1168   :  { %2540 = vst.msk [vmem:[#allocation5] sm:$0xff] %vm56_vm0, %v2538_v28 }
0x1169   :  { %3410 = shalt.err (!%p3407_p0)
}
0x116a   :  { %s3411_s11 = scalar_lea.hbm %s4051_s6, 256 }
0x116b   :  { %p3412_p1 = scmp.ne.s32.totalorder %s4051_s6, %s3411_s11  ;;  %p3415_p2 = scmp.lt.u32.totalorder %s3411_s11, %s4051_s6 }
0x116d   :  { %p3417_p3 = pnand %p3415_p2, %p3412_p1 }
0x116f   :  { %3420 = shalt.err (!%p3417_p3)
}
0x1170   :  { %2553 = dma.vmem_to_hbm [thread:$0]  %s2548_s4, 256, %s4051_s6, [#allocation4], %s3428_s15, %s3428_s15, %s3429_s16  }
0x1171   :  { %3423 = dma.done.wait [#allocation4], 256  }
0x1172   :  { %3424 = vsyncadd [#allocation4], 4294967040 }
0x1173   :  { %3425 = dma.done.wait [#allocation7], 2048  }
0x1174   :  { %3426 = vsyncadd [#allocation7], 4294965248 }
0x1175   :  { %2587 = vsyncpa [#allocation3], 1 }
0x1176   :  { %2588 = vsyncpa [#allocation4], 1 }
0x1177   :  { %2589 = vsyncpa [#allocation7], 1 }

</bundles_post_ra>
